<compile_context>
chip_gen: v5e
topology: v5e:2x2
jax: 0.10.0
libtpu: 0.0.40
codegen_flags: <defaults>
</compile_context>

<pallas_src>
import jax
import jax.numpy as jnp
from jax.experimental import pallas as pl
from jax.experimental.pallas import tpu as pltpu


def _make_fused_kernel(*, num_layers, w0_width, mxu_dtype):
    """Fused SharedCNN forward for ONE batch sample.

    Every activation is kept flattened as (rows, F) where row p encodes the
    spatial position p = i * w0_width + j (w0_width = width after the first
    conv, kept constant for all layers).  For a stride-1 VALID 3x3 conv, tap
    (di, dj) of output row p is simply input row p + di*w0_width + dj, so the
    im2col matrix is 9 contiguous row slices concatenated along lanes.  Rows
    with j >= (valid width of that layer) hold finite garbage; they never feed
    a valid output position and are sliced away by the wrapper at the end.
    """
    W0 = w0_width

    def kernel(p0_ref, w0_ref, wr_ref, b_ref, o_ref):
        F = w0_ref.shape[-1]
        bias = b_ref[...]                                    # (L, F) f32

        # ---- Layer 0: fused NormalizeImg + u8->f32 cast + stride-2 conv as ONE matmul.
        p0 = p0_ref[0]                                       # (H1*W1, 9*C) uint8
        x0 = p0.astype(jnp.float32) * (1.0 / 255.0)          # direct cast, fused /255
        acc = jnp.dot(x0.astype(mxu_dtype), w0_ref[...],
                      preferred_element_type=jnp.float32)    # (H1*W1, F) f32 accum
        a = acc + bias[0:1, :]
        n = p0_ref.shape[1]                                  # = H1 * W0 rows

        # ---- Layers 1..L-1: producer-side ReLU, tap-folded im2col, one matmul each.
        for l in range(1, num_layers):
            a = jnp.maximum(a, 0.0)                          # ReLU in f32 vregs (free VPU)
            a_lo = jnp.concatenate(
                [a.astype(mxu_dtype), jnp.zeros((2, F), mxu_dtype)], axis=0)
            n_out = n - 2 * W0
            patches = jnp.concatenate(
                [a_lo[di * W0 + dj: di * W0 + dj + n_out, :]
                 for di in range(3) for dj in range(3)],
                axis=1)                                       # (n_out, 9F) bf16, K=288
            acc = jnp.dot(patches, wr_ref[l - 1],
                          preferred_element_type=jnp.float32)
            a = acc + bias[l:l + 1, :]
            n = n_out

        # No ReLU after the last conv (matches the nn.Sequential).  Single dense store.
        o_ref[...] = a.reshape(1, n, F)

    return kernel


def shared_cnn_forward(x_nchw, weights, biases, *, out_dtype=jnp.float32,
                       mxu_dtype=jnp.bfloat16):
    """SharedCNN.forward: Normalize -> Conv(3x3,s=2) -> [ReLU -> Conv(3x3,s=1)]*(L-1).

    x_nchw : (B, C, H, W) raw pixels (uint8 or float, 0..255 range).
    weights: list of HWIO (3, 3, Cin, Cout) conv weights.
    biases : list of (Cout,) biases.
    Returns the NCHW feature map, matching the PyTorch module.
    """
    # TODO(synk): CoordConv (coord_conv=True) branch not implemented; this is the
    # default coord_conv=False path of SharedCNN.
    L = len(weights)
    assert L == len(biases) and L >= 1
    B, C, H, W = x_nchw.shape
    F = weights[0].shape[-1]
    assert weights[0].shape[:3] == (3, 3, C)
    for w in weights[1:]:
        assert w.shape == (3, 3, F, F)

    H1 = (H - 3) // 2 + 1           # spatial dims after the stride-2 conv
    W1 = (W - 3) // 2 + 1
    HL = H1 - 2 * (L - 1)           # final spatial dims after the stride-1 convs
    WL = W1 - 2 * (L - 1)
    assert HL >= 1 and WL >= 1, "input too small for this many layers"

    # --- Tiny XLA prologue on the raw uint8 pixels: NCHW->NHWC + stride-2 im2col.
    # Replaces the in-kernel strided loads (which failed to lower) with one dense
    # (H1*W1, 9C) uint8 patch matrix per sample; the /255 normalisation and the
    # uint8 -> f32 cast still happen inside the kernel.
    x = jnp.transpose(x_nchw, (0, 2, 3, 1))                   # (B, H, W, C)
    taps = [x[:, di:di + 2 * H1 - 1:2, dj:dj + 2 * W1 - 1:2, :]
            for di in range(3) for dj in range(3)]            # 9 x (B, H1, W1, C)
    patches0 = jnp.stack(taps, axis=3).reshape(B, H1 * W1, 9 * C)

    # --- Weights as tap-major (9*Cin, Cout) slabs, pre-cast ONCE to the MXU dtype.
    w0 = weights[0].reshape(9 * C, F).astype(mxu_dtype)
    if L > 1:
        w_rest = jnp.stack([w.reshape(9 * F, F) for w in weights[1:]]).astype(mxu_dtype)
    else:
        w_rest = jnp.zeros((1, 9 * F, F), mxu_dtype)          # unused dummy
    b_all = jnp.stack([b.astype(jnp.float32) for b in biases])  # (L, F) f32

    n_last = HL * W1
    kernel = _make_fused_kernel(num_layers=L, w0_width=W1, mxu_dtype=mxu_dtype)

    y_flat = pl.pallas_call(
        kernel,
        out_shape=jax.ShapeDtypeStruct((B, n_last, F), jnp.float32),
        grid=(B,),
        in_specs=[
            # Per-sample uint8 patch matrix (raw pixels go straight into the kernel).
            pl.BlockSpec((1, H1 * W1, 9 * C), lambda n: (n, 0, 0)),
            # Weights / biases: tiny, constant across the grid (stay resident).
            pl.BlockSpec((9 * C, F), lambda n: (0, 0)),
            pl.BlockSpec((w_rest.shape[0], 9 * F, F), lambda n: (0, 0, 0)),
            pl.BlockSpec((L, F), lambda n: (0, 0)),
        ],
        out_specs=pl.BlockSpec((1, n_last, F), lambda n: (n, 0, 0)),
        compiler_params=pltpu.CompilerParams(
            dimension_semantics=("parallel",)),               # v7x: shard batch over TCs
    )(patches0, w0, w_rest, b_all)

    # --- Valid-region extraction + NCHW (tiny XLA epilogue on ~7 KB/sample).
    y = y_flat.reshape(B, HL, W1, F)[:, :, :WL, :]
    return jnp.transpose(y, (0, 3, 1, 2)).astype(out_dtype)


if __name__ == "__main__":
    B, C, H, W = 2, 3, 24, 24
    num_layers, num_filters = 4, 32

    key = jax.random.PRNGKey(0)
    key, kx = jax.random.split(key)
    # Raw uint8 pixels stay uint8 all the way into the fused kernel.
    x = jax.random.randint(kx, (B, C, H, W), 0, 256).astype(jnp.uint8)

    weights, biases = [], []
    cin = C
    for _ in range(num_layers):
        key, kw_, kb_ = jax.random.split(key, 3)
        fan_in = 3 * 3 * cin
        weights.append(jax.random.normal(kw_, (3, 3, cin, num_filters),
                                         jnp.float32) / jnp.sqrt(float(fan_in)))
        biases.append(0.1 * jax.random.normal(kb_, (num_filters,), jnp.float32))
        cin = num_filters

    fwd = jax.jit(shared_cnn_forward)
    y = fwd(x, weights, biases)
    jax.block_until_ready(y)

    # Pure-JAX reference: /255, VALID 3x3 convs (f32), ReLU between convs only.
    def reference(x, weights, biases):
        h = jnp.transpose(x.astype(jnp.float32) / 255.0, (0, 2, 3, 1))
        for i, (w, b) in enumerate(zip(weights, biases)):
            if i > 0:
                h = jnp.maximum(h, 0.0)
            s = 2 if i == 0 else 1
            h = jax.lax.conv_general_dilated(
                h, w, window_strides=(s, s), padding="VALID",
                dimension_numbers=("NHWC", "HWIO", "NHWC")) + b
        return jnp.transpose(h, (0, 3, 1, 2))

    y_ref = reference(x, weights, biases)
    assert y.shape == y_ref.shape == (B, num_filters, 5, 5), (y.shape, y_ref.shape)
    max_err = float(jnp.max(jnp.abs(y - y_ref)))
    # bf16 MXU operands with f32 accumulation vs. an all-f32 reference -> ~1e-2.
    assert jnp.allclose(y, y_ref, rtol=1e-2, atol=1e-2), (
        f"mismatch vs reference, max abs err = {max_err}")
    print("KERNEL_OK")
</pallas_src>

<mosaic_0001>
module attributes {stable_mosaic.version = 11 : i64} {
  func.func @kernel(%arg0: i32, %arg1: memref<1x121x27xi8, #tpu.memory_space<vmem>>, %arg2: memref<27x32xbf16, #tpu.memory_space<vmem>>, %arg3: memref<3x288x32xbf16, #tpu.memory_space<vmem>>, %arg4: memref<4x32xf32, #tpu.memory_space<vmem>>, %arg5: memref<1x55x32xf32, #tpu.memory_space<vmem>>) attributes {dimension_semantics = [#tpu.dimension_semantics<parallel>], iteration_bounds = array<i64: 2>, scalar_prefetch = 0 : i64, scratch_operands = 0 : i64, tpu.core_type = #tpu.core_type<tc>, window_params = [{transform_indices = @transform_0, window_bounds = array<i64: 1, 121, 27>}, {pipeline_mode = #tpu.pipeline_mode<synchronous>, transform_indices = @transform_1, window_bounds = array<i64: 27, 32>}, {pipeline_mode = #tpu.pipeline_mode<synchronous>, transform_indices = @transform_2, window_bounds = array<i64: 3, 288, 32>}, {pipeline_mode = #tpu.pipeline_mode<synchronous>, transform_indices = @transform_3, window_bounds = array<i64: 4, 32>}, {transform_indices = @transform_4, window_bounds = array<i64: 1, 55, 32>}]} {
    %c0 = arith.constant 0 : index
    %c0_0 = arith.constant 0 : index
    %0 = vector.load %arg4[%c0, %c0_0] : memref<4x32xf32, #tpu.memory_space<vmem>>, vector<4x32xf32>
    %c0_1 = arith.constant 0 : index
    %c0_2 = arith.constant 0 : index
    %c0_3 = arith.constant 0 : index
    %1 = vector.load %arg1[%c0_1, %c0_2, %c0_3] : memref<1x121x27xi8, #tpu.memory_space<vmem>>, vector<1x121x27xi8>
    %2 = vector.shape_cast %1 : vector<1x121x27xi8> to vector<121x27xi8>
    %3 = arith.uitofp %2 : vector<121x27xi8> to vector<121x27xf32>
    %cst = arith.constant 0.00392156886 : f32
    %4 = vector.broadcast %cst : f32 to vector<121x27xf32>
    %5 = arith.mulf %3, %4 : vector<121x27xf32>
    %6 = arith.truncf %5 : vector<121x27xf32> to vector<121x27xbf16>
    %c0_4 = arith.constant 0 : index
    %c0_5 = arith.constant 0 : index
    %7 = vector.load %arg2[%c0_4, %c0_5] : memref<27x32xbf16, #tpu.memory_space<vmem>>, vector<27x32xbf16>
    %cst_6 = arith.constant dense<0.000000e+00> : vector<121x32xf32>
    %8 = tpu.matmul %6, %7, %cst_6 {dimension_numbers = #tpu.dot_dimension_numbers<[1], [0], [0], [1], [0, 0, 1, 1], [], []>} : vector<121x27xbf16>, vector<27x32xbf16>, vector<121x32xf32> -> vector<121x32xf32>
    %9 = vector.extract_strided_slice %0 {offsets = [0, 0], sizes = [1, 32], strides = [1, 1]} : vector<4x32xf32> to vector<1x32xf32>
    %10 = vector.broadcast %9 : vector<1x32xf32> to vector<121x32xf32>
    %11 = arith.addf %8, %10 : vector<121x32xf32>
    %cst_7 = arith.constant 0.000000e+00 : f32
    %12 = vector.broadcast %cst_7 : f32 to vector<121x32xf32>
    %13 = arith.maximumf %11, %12 : vector<121x32xf32>
    %14 = arith.truncf %13 : vector<121x32xf32> to vector<121x32xbf16>
    %cst_8 = arith.constant 0.000000e+00 : bf16
    %15 = vector.broadcast %cst_8 : bf16 to vector<2x32xbf16>
    %16 = tpu.concatenate %14, %15 in 0 : vector<121x32xbf16>, vector<2x32xbf16> -> vector<123x32xbf16>
    %17 = vector.extract_strided_slice %16 {offsets = [0, 0], sizes = [99, 32], strides = [1, 1]} : vector<123x32xbf16> to vector<99x32xbf16>
    %18 = vector.extract_strided_slice %16 {offsets = [1, 0], sizes = [99, 32], strides = [1, 1]} : vector<123x32xbf16> to vector<99x32xbf16>
    %19 = vector.extract_strided_slice %16 {offsets = [2, 0], sizes = [99, 32], strides = [1, 1]} : vector<123x32xbf16> to vector<99x32xbf16>
    %20 = vector.extract_strided_slice %16 {offsets = [11, 0], sizes = [99, 32], strides = [1, 1]} : vector<123x32xbf16> to vector<99x32xbf16>
    %21 = vector.extract_strided_slice %16 {offsets = [12, 0], sizes = [99, 32], strides = [1, 1]} : vector<123x32xbf16> to vector<99x32xbf16>
    %22 = vector.extract_strided_slice %16 {offsets = [13, 0], sizes = [99, 32], strides = [1, 1]} : vector<123x32xbf16> to vector<99x32xbf16>
    %23 = vector.extract_strided_slice %16 {offsets = [22, 0], sizes = [99, 32], strides = [1, 1]} : vector<123x32xbf16> to vector<99x32xbf16>
    %24 = vector.extract_strided_slice %16 {offsets = [23, 0], sizes = [99, 32], strides = [1, 1]} : vector<123x32xbf16> to vector<99x32xbf16>
    %25 = vector.extract_strided_slice %16 {offsets = [24, 0], sizes = [99, 32], strides = [1, 1]} : vector<123x32xbf16> to vector<99x32xbf16>
    %26 = tpu.concatenate %17, %18, %19, %20, %21, %22, %23, %24, %25 in 1 : vector<99x32xbf16>, vector<99x32xbf16>, vector<99x32xbf16>, vector<99x32xbf16>, vector<99x32xbf16>, vector<99x32xbf16>, vector<99x32xbf16>, vector<99x32xbf16>, vector<99x32xbf16> -> vector<99x288xbf16>
    %c0_9 = arith.constant 0 : index
    %c0_10 = arith.constant 0 : index
    %c0_11 = arith.constant 0 : index
    %27 = vector.load %arg3[%c0_9, %c0_10, %c0_11] : memref<3x288x32xbf16, #tpu.memory_space<vmem>>, vector<1x288x32xbf16>
    %28 = vector.shape_cast %27 : vector<1x288x32xbf16> to vector<288x32xbf16>
    %cst_12 = arith.constant dense<0.000000e+00> : vector<99x32xf32>
    %29 = tpu.matmul %26, %28, %cst_12 {dimension_numbers = #tpu.dot_dimension_numbers<[1], [0], [0], [1], [0, 0, 1, 1], [], []>} : vector<99x288xbf16>, vector<288x32xbf16>, vector<99x32xf32> -> vector<99x32xf32>
    %30 = vector.extract_strided_slice %0 {offsets = [1, 0], sizes = [1, 32], strides = [1, 1]} : vector<4x32xf32> to vector<1x32xf32>
    %31 = vector.broadcast %30 : vector<1x32xf32> to vector<99x32xf32>
    %32 = arith.addf %29, %31 : vector<99x32xf32>
    %cst_13 = arith.constant 0.000000e+00 : f32
    %33 = vector.broadcast %cst_13 : f32 to vector<99x32xf32>
    %34 = arith.maximumf %32, %33 : vector<99x32xf32>
    %35 = arith.truncf %34 : vector<99x32xf32> to vector<99x32xbf16>
    %cst_14 = arith.constant 0.000000e+00 : bf16
    %36 = vector.broadcast %cst_14 : bf16 to vector<2x32xbf16>
    %37 = tpu.concatenate %35, %36 in 0 : vector<99x32xbf16>, vector<2x32xbf16> -> vector<101x32xbf16>
    %38 = vector.extract_strided_slice %37 {offsets = [0, 0], sizes = [77, 32], strides = [1, 1]} : vector<101x32xbf16> to vector<77x32xbf16>
    %39 = vector.extract_strided_slice %37 {offsets = [1, 0], sizes = [77, 32], strides = [1, 1]} : vector<101x32xbf16> to vector<77x32xbf16>
    %40 = vector.extract_strided_slice %37 {offsets = [2, 0], sizes = [77, 32], strides = [1, 1]} : vector<101x32xbf16> to vector<77x32xbf16>
    %41 = vector.extract_strided_slice %37 {offsets = [11, 0], sizes = [77, 32], strides = [1, 1]} : vector<101x32xbf16> to vector<77x32xbf16>
    %42 = vector.extract_strided_slice %37 {offsets = [12, 0], sizes = [77, 32], strides = [1, 1]} : vector<101x32xbf16> to vector<77x32xbf16>
    %43 = vector.extract_strided_slice %37 {offsets = [13, 0], sizes = [77, 32], strides = [1, 1]} : vector<101x32xbf16> to vector<77x32xbf16>
    %44 = vector.extract_strided_slice %37 {offsets = [22, 0], sizes = [77, 32], strides = [1, 1]} : vector<101x32xbf16> to vector<77x32xbf16>
    %45 = vector.extract_strided_slice %37 {offsets = [23, 0], sizes = [77, 32], strides = [1, 1]} : vector<101x32xbf16> to vector<77x32xbf16>
    %46 = vector.extract_strided_slice %37 {offsets = [24, 0], sizes = [77, 32], strides = [1, 1]} : vector<101x32xbf16> to vector<77x32xbf16>
    %47 = tpu.concatenate %38, %39, %40, %41, %42, %43, %44, %45, %46 in 1 : vector<77x32xbf16>, vector<77x32xbf16>, vector<77x32xbf16>, vector<77x32xbf16>, vector<77x32xbf16>, vector<77x32xbf16>, vector<77x32xbf16>, vector<77x32xbf16>, vector<77x32xbf16> -> vector<77x288xbf16>
    %c1 = arith.constant 1 : index
    %c0_15 = arith.constant 0 : index
    %c0_16 = arith.constant 0 : index
    %48 = vector.load %arg3[%c1, %c0_15, %c0_16] : memref<3x288x32xbf16, #tpu.memory_space<vmem>>, vector<1x288x32xbf16>
    %49 = vector.shape_cast %48 : vector<1x288x32xbf16> to vector<288x32xbf16>
    %cst_17 = arith.constant dense<0.000000e+00> : vector<77x32xf32>
    %50 = tpu.matmul %47, %49, %cst_17 {dimension_numbers = #tpu.dot_dimension_numbers<[1], [0], [0], [1], [0, 0, 1, 1], [], []>} : vector<77x288xbf16>, vector<288x32xbf16>, vector<77x32xf32> -> vector<77x32xf32>
    %51 = vector.extract_strided_slice %0 {offsets = [2, 0], sizes = [1, 32], strides = [1, 1]} : vector<4x32xf32> to vector<1x32xf32>
    %52 = vector.broadcast %51 : vector<1x32xf32> to vector<77x32xf32>
    %53 = arith.addf %50, %52 : vector<77x32xf32>
    %cst_18 = arith.constant 0.000000e+00 : f32
    %54 = vector.broadcast %cst_18 : f32 to vector<77x32xf32>
    %55 = arith.maximumf %53, %54 : vector<77x32xf32>
    %56 = arith.truncf %55 : vector<77x32xf32> to vector<77x32xbf16>
    %cst_19 = arith.constant 0.000000e+00 : bf16
    %57 = vector.broadcast %cst_19 : bf16 to vector<2x32xbf16>
    %58 = tpu.concatenate %56, %57 in 0 : vector<77x32xbf16>, vector<2x32xbf16> -> vector<79x32xbf16>
    %59 = vector.extract_strided_slice %58 {offsets = [0, 0], sizes = [55, 32], strides = [1, 1]} : vector<79x32xbf16> to vector<55x32xbf16>
    %60 = vector.extract_strided_slice %58 {offsets = [1, 0], sizes = [55, 32], strides = [1, 1]} : vector<79x32xbf16> to vector<55x32xbf16>
    %61 = vector.extract_strided_slice %58 {offsets = [2, 0], sizes = [55, 32], strides = [1, 1]} : vector<79x32xbf16> to vector<55x32xbf16>
    %62 = vector.extract_strided_slice %58 {offsets = [11, 0], sizes = [55, 32], strides = [1, 1]} : vector<79x32xbf16> to vector<55x32xbf16>
    %63 = vector.extract_strided_slice %58 {offsets = [12, 0], sizes = [55, 32], strides = [1, 1]} : vector<79x32xbf16> to vector<55x32xbf16>
    %64 = vector.extract_strided_slice %58 {offsets = [13, 0], sizes = [55, 32], strides = [1, 1]} : vector<79x32xbf16> to vector<55x32xbf16>
    %65 = vector.extract_strided_slice %58 {offsets = [22, 0], sizes = [55, 32], strides = [1, 1]} : vector<79x32xbf16> to vector<55x32xbf16>
    %66 = vector.extract_strided_slice %58 {offsets = [23, 0], sizes = [55, 32], strides = [1, 1]} : vector<79x32xbf16> to vector<55x32xbf16>
    %67 = vector.extract_strided_slice %58 {offsets = [24, 0], sizes = [55, 32], strides = [1, 1]} : vector<79x32xbf16> to vector<55x32xbf16>
    %68 = tpu.concatenate %59, %60, %61, %62, %63, %64, %65, %66, %67 in 1 : vector<55x32xbf16>, vector<55x32xbf16>, vector<55x32xbf16>, vector<55x32xbf16>, vector<55x32xbf16>, vector<55x32xbf16>, vector<55x32xbf16>, vector<55x32xbf16>, vector<55x32xbf16> -> vector<55x288xbf16>
    %c2 = arith.constant 2 : index
    %c0_20 = arith.constant 0 : index
    %c0_21 = arith.constant 0 : index
    %69 = vector.load %arg3[%c2, %c0_20, %c0_21] : memref<3x288x32xbf16, #tpu.memory_space<vmem>>, vector<1x288x32xbf16>
    %70 = vector.shape_cast %69 : vector<1x288x32xbf16> to vector<288x32xbf16>
    %cst_22 = arith.constant dense<0.000000e+00> : vector<55x32xf32>
    %71 = tpu.matmul %68, %70, %cst_22 {dimension_numbers = #tpu.dot_dimension_numbers<[1], [0], [0], [1], [0, 0, 1, 1], [], []>} : vector<55x288xbf16>, vector<288x32xbf16>, vector<55x32xf32> -> vector<55x32xf32>
    %72 = vector.extract_strided_slice %0 {offsets = [3, 0], sizes = [1, 32], strides = [1, 1]} : vector<4x32xf32> to vector<1x32xf32>
    %73 = vector.broadcast %72 : vector<1x32xf32> to vector<55x32xf32>
    %74 = arith.addf %71, %73 : vector<55x32xf32>
    %75 = vector.shape_cast %74 : vector<55x32xf32> to vector<1x55x32xf32>
    %c0_23 = arith.constant 0 : index
    %c0_24 = arith.constant 0 : index
    %c0_25 = arith.constant 0 : index
    %76 = vector.load %arg5[%c0_23, %c0_24, %c0_25] : memref<1x55x32xf32, #tpu.memory_space<vmem>>, vector<1x55x32xf32>
    tpu.vector_store %arg5[%c0_23, %c0_24, %c0_25], %75 {strides = array<i32>} : memref<1x55x32xf32, #tpu.memory_space<vmem>>, vector<1x55x32xf32>,
    return
  }
  func.func @transform_0(%arg0: i32) -> (i32, i32, i32) {
    %c0_i32 = arith.constant 0 : i32
    %c0_i32_0 = arith.constant 0 : i32
    %c0_i32_1 = arith.constant 0 : i32
    return %arg0, %c0_i32, %c0_i32_0 : i32, i32, i32
  }
  func.func @transform_1(%arg0: i32) -> (i32, i32) {
    %c0_i32 = arith.constant 0 : i32
    %c0_i32_0 = arith.constant 0 : i32
    %c0_i32_1 = arith.constant 0 : i32
    return %c0_i32, %c0_i32_0 : i32, i32
  }
  func.func @transform_2(%arg0: i32) -> (i32, i32, i32) {
    %c0_i32 = arith.constant 0 : i32
    %c0_i32_0 = arith.constant 0 : i32
    %c0_i32_1 = arith.constant 0 : i32
    %c0_i32_2 = arith.constant 0 : i32
    return %c0_i32, %c0_i32_0, %c0_i32_1 : i32, i32, i32
  }
  func.func @transform_3(%arg0: i32) -> (i32, i32) {
    %c0_i32 = arith.constant 0 : i32
    %c0_i32_0 = arith.constant 0 : i32
    %c0_i32_1 = arith.constant 0 : i32
    return %c0_i32, %c0_i32_0 : i32, i32
  }
  func.func @transform_4(%arg0: i32) -> (i32, i32, i32) {
    %c0_i32 = arith.constant 0 : i32
    %c0_i32_0 = arith.constant 0 : i32
    %c0_i32_1 = arith.constant 0 : i32
    return %arg0, %c0_i32, %c0_i32_0 : i32, i32, i32
  }
}

</mosaic_0001>

<bundles_post_ra>
// kernel: shared_cnn_forward.1
= control target key start
LH: loop header
LB: loop body
LE: loop exit
PB: predicated region body
PF: predicated region fallthrough
CT: control target
= control target key end

     0   :  { %s2834_s15 = smov 0   ;;  %s3874_s0 = inlined_call_operand.vmem [shape: u8[2,121,27], index: 0, kind: input, shape index: {}]   ;;  %s3875_s1 = inlined_call_operand.vmem [shape: bf16[27,32], index: 1, kind: input, shape index: {}]   ;;  %s3876_s2 = inlined_call_operand.vmem [shape: bf16[3,288,32], index: 2, kind: input, shape index: {}]   ;;  %s3877_s3 = inlined_call_operand.vmem [shape: f32[4,32], index: 3, kind: input, shape index: {}]   ;;  %s3878_s4 = inlined_call_operand.vmem [shape: f32[2,55,32], index: 4, kind: output, shape index: {}]  }
   0x1 LB: > { %s2352_s16 = sadd.s32 4294967295, %s2803_s15   ;;  %p2356_p0 = scmp.ge.s32.totalorder %s2803_s15, 1  ;;  %s2803_s15 = sphi %s2834_s15, %s14_s15  }
   0x2   : > { %p162_p1 = scmp.lt.s32.totalorder %s2803_s15, 3 }
   0x4   : > { %p163_p2 = pnand %p2356_p0, %p162_p1 }
   0x5   : > { %p188_p3 = scmp.lt.s32.totalorder (!%p163_p2), %s2352_s16, 1  ;;  %s2806_s7 = smov (!%p163_p2), 32  }
   0x6   : > { %166 = sbr.rel (%p163_p2) target bundleno = 1243 (0x4db), region = 36  ;;  %s2807_s8 = smov (!%p163_p2), 96  }
   0x7   : > { %s2808_s9 = smov (!%p163_p2), 64  }
   0xb   : > { %v2366_v0 = vld [vmem:[%s3875_s1 + $0x8] sm:$0xf]  ;;  %v2684_v1 = vld [vmem:[%s3875_s1 + $0x8] sm:$0x30]  ;;  %vm329_vm0 = vcmask 1044480   ;;  %vm330_vm1 = vcmask 1045504  }
   0xc   : > { %v2367_v2 = vor.u32 %v2684_v1, %v2366_v0  ;;  %v2805_v3 = vmov 65535   ;;  %s3880_s16 = smov (!%p188_p3, %s2352_s16), 1  ;;  %v2683_v7 = vld [vmem:[%s3875_s1] sm:$0xff]  ;;  %vm304_vm2 = vcmask 220160   ;;  %vm462_vm3 = vsmask.f32 7424 }
   0xd   : > { %v331_v4 = vsel %vm329_vm0, 4294967295, %v2805_v3  ;;  %s2682_s21 = sshll.u32 %s3880_s16, 5  ;;  %vm560_vm4 = vsmask.f32 2304  ;;  %vm616_vm5 = vsmask.f32 1280 }
   0xe   : > { %v332_v5 = vsel %vm330_vm1, %v331_v4, 0  ;;  %s2858_s26 = scalar_lea.vmem %s3874_s0, %s2682_s21  ;;  %vm532_vm6 = vcmask 1046528   ;;  %vm459_vm7 = vsmask.f32 4352  ;;  %vm746_vm8 = vcmask 261120   ;;  %s2783_s5 = smul.u32 56, %s3880_s16 }
   0xf   : > { %v334_v6 = vand.u32 %v2367_v2, %v332_v5  ;;  %v2740_v8 = vld [vmem:[%s2858_s26] sm:$0xff]   ;;  %v2778_v26 = vld [vmem:[%s2858_s26 + $0x8] sm:$0xff]   ;;  %v2780_v45 = vld [vmem:[%s2858_s26 + $0x10] sm:$0xff]   ;;  %vm732_vm9 = vcmask 1043456   ;;  %vm761_vm11 = vcmask 523264   ;;  %vm776_vm12 = vcmask 785408  }
  0x10   : > { %v2741_v9 = vunpack.c.0.s8 %v2740_v8  ;;  %v2742_v10 = vunpack.c.1.s8 %v2740_v8  ;;  %v2745_v17 = vunpack.c.2.s8 %v2740_v8  ;;  %v2746_v18 = vunpack.c.3.s8 %v2740_v8  ;;  %v2782_v0 = vld [vmem:[%s2858_s26 + $0x18] sm:$0xf]   ;;  %vm460_vm10 = vmand %vm329_vm0, %vm459_vm7  ;;  %s3856_s11 = scalar_lea.vmem %s3878_s4, %s2783_s5 }
  0x11   : > { %342 = vmatpush.bf16.msra.mxu0 %v334_v6  ;;  %v2749_v28 = vunpack.c.0.s8 %v2778_v26  ;;  %v2750_v29 = vunpack.c.1.s8 %v2778_v26  ;;  %v2753_v37 = vunpack.c.2.s8 %v2778_v26  ;;  %v2754_v38 = vunpack.c.3.s8 %v2778_v26 }
  0x12   : > { %v232_v11 = vand.u32 255, %v2741_v9  ;;  %v233_v12 = vand.u32 255, %v2742_v10  ;;  %v234_v20 = vand.u32 255, %v2745_v17  ;;  %v235_v21 = vand.u32 255, %v2746_v18  ;;  %v214_v10 = vld [vmem:[%s2858_s26 + $0x1c] sm:$0x3] }
  0x13   : > { %v236_v30 = vand.u32 255, %v2749_v28  ;;  %v237_v31 = vand.u32 255, %v2750_v29  ;;  %v238_v39 = vand.u32 255, %v2753_v37  ;;  %v239_v40 = vand.u32 255, %v2754_v38 }
  0x14   : > { %v248_v13 = vcvt.s32.f32 %v232_v11  ;;  %v249_v14 = vcvt.s32.f32 %v233_v12  ;;  %v250_v22 = vcvt.s32.f32 %v234_v20  ;;  %v251_v23 = vcvt.s32.f32 %v235_v21  ;;  %v215_v11 = vld [vmem:[%s2858_s26 + $0x1e] sm:$0x1] }
  0x15   : > { %343 = vmatpush.bf16.msra.mxu0 %v2683_v7  ;;  %v252_v32 = vcvt.s32.f32 %v236_v30  ;;  %v253_v33 = vcvt.s32.f32 %v237_v31  ;;  %v254_v41 = vcvt.s32.f32 %v238_v39  ;;  %v255_v42 = vcvt.s32.f32 %v239_v40 }
  0x16   : > { %v264_v15 = vmul.f32 0.003921569, %v248_v13  ;;  %v265_v16 = vmul.f32 0.003921569, %v249_v14  ;;  %v266_v24 = vmul.f32 0.003921569, %v250_v22  ;;  %v2757_v47 = vunpack.c.0.s8 %v2780_v45 }
  0x17   : > { %v267_v25 = vmul.f32 0.003921569, %v251_v23  ;;  %v268_v34 = vmul.f32 0.003921569, %v252_v32  ;;  %v269_v35 = vmul.f32 0.003921569, %v253_v33  ;;  %v2758_v48 = vunpack.c.1.s8 %v2780_v45 }
  0x18   : > { %v280_v19 = vpack.c.bf16 %v265_v16, %v264_v15  ;;  %v270_v43 = vmul.f32 0.003921569, %v254_v41  ;;  %v271_v44 = vmul.f32 0.003921569, %v255_v42  ;;  %v240_v49 = vand.u32 255, %v2757_v47 }
  0x19   : > { %v281_v27 = vpack.c.bf16 %v267_v25, %v266_v24  ;;  %v282_v36 = vpack.c.bf16 %v269_v35, %v268_v34  ;;  %v241_v50 = vand.u32 255, %v2758_v48  ;;  %v2761_v56 = vunpack.c.2.s8 %v2780_v45  ;;  %v2877_v22 = vld [vmem:[%s3877_s3] sm:$0xf]  ;;  %v2893_v48 = vld [vmem:[%s3876_s2 + $0x88] sm:$0xff] }
  0x1a   : > { %2368 = vmatmul.msk.bf16.vlgmr.msra.gmra.mxu0 %vm304_vm2, %v280_v19  ;;  %v283_v46 = vpack.c.bf16 %v271_v44, %v270_v43  ;;  %v256_v51 = vcvt.s32.f32 %v240_v49  ;;  %v2762_v57 = vunpack.c.3.s8 %v2780_v45  ;;  %v2765_v2 = vunpack.c.0.s8 %v2782_v0  ;;  %2767 = vmatpush.bf16.msra.mxu3 %v2893_v48 }
  0x1b   : > { %v257_v52 = vcvt.s32.f32 %v241_v50  ;;  %v242_v58 = vand.u32 255, %v2761_v56  ;;  %v2766_v3 = vunpack.c.1.s8 %v2782_v0  ;;  %v230_v13 = vunpack.c.0.s8 %v214_v10 }
  0x1c   : > { %v272_v53 = vmul.f32 0.003921569, %v256_v51  ;;  %v243_v59 = vand.u32 255, %v2762_v57  ;;  %v244_v4 = vand.u32 255, %v2765_v2  ;;  %v231_v14 = vunpack.c.0.s8 %v215_v11 }
  0x1d   : > { %v273_v54 = vmul.f32 0.003921569, %v257_v52  ;;  %v258_v60 = vcvt.s32.f32 %v242_v58  ;;  %v245_v5 = vand.u32 255, %v2766_v3  ;;  %v246_v15 = vand.u32 255, %v230_v13 }
  0x1e   : > { %v259_v61 = vcvt.s32.f32 %v243_v59  ;;  %v260_v6 = vcvt.s32.f32 %v244_v4  ;;  %v247_v16 = vand.u32 255, %v231_v14  ;;  %v2880_v23 = vperm.slane %v2877_v22, 0 }
  0x1f   : > { %v284_v55 = vpack.c.bf16 %v273_v54, %v272_v53  ;;  %v274_v62 = vmul.f32 0.003921569, %v258_v60  ;;  %v261_v7 = vcvt.s32.f32 %v245_v5  ;;  %v262_v17 = vcvt.s32.f32 %v246_v15 }
  0x20   : > { %v275_v63 = vmul.f32 0.003921569, %v259_v61  ;;  %v276_v8 = vmul.f32 0.003921569, %v260_v6  ;;  %v263_v18 = vcvt.s32.f32 %v247_v16  ;;  %vm602_vm13 = vcmask 1041408  }
  0x21   : > { %v277_v9 = vmul.f32 0.003921569, %v261_v7  ;;  %v278_v19 = vmul.f32 0.003921569, %v262_v17  ;;  %vm1209_vm14 = vmand %vm602_vm13, %vm616_vm5  ;;  %vm1816_vm15 = vsmask.f32 6400 }
  0x22   : > { %v285_v1 = vpack.c.bf16 %v275_v63, %v274_v62  ;;  %v279_v20 = vmul.f32 0.003921569, %v263_v18  ;;  %vm1817_vm1 = vmand %vm532_vm6, %vm1816_vm15 }
  0x23   : > { %v286_v12 = vpack.c.bf16 %v277_v9, %v276_v8 }
  0x24   : > { %v287_v21 = vpack.c.bf16 %v279_v20, %v278_v19 }
  0x2a   : > { %2369 = vmatmul.msk.bf16.gmra.mxu0 %vm304_vm2, %v281_v27 }
  0x3a   : > { %2370 = vmatmul.msk.bf16.gmra.mxu0 %vm304_vm2, %v282_v36 }
  0x4a   : > { %2371 = vmatmul.msk.bf16.gmra.mxu0 %vm304_vm2, %v283_v46 }
  0x5a   : > { %2372 = vmatmul.msk.bf16.gmra.mxu0 %vm304_vm2, %v284_v55  ;;  %v2901_v55 = vld [vmem:[%s3876_s2 + $0x80] sm:$0xff] }
  0x5b   : > { %2768 = vmatpush.bf16.msra.mxu3 %v2901_v55 }
  0x6a   : > { %2373 = vmatmul.msk.bf16.gmra.mxu0 %vm304_vm2, %v285_v1 }
  0x7a   : > { %2374 = vmatmul.msk.bf16.gmra.mxu0 %vm304_vm2, %v286_v12 }
  0x8a   : > { %2375 = vmatmul.msk.bf16.gmra.mxu0 %vm304_vm2, %v287_v21 }
  0x97   : > { %v345_v24 = vpop.f32.mrf.mxu0 }
  0x98   : > { %v346_v25 = vadd.f32 %v345_v24, %v2880_v23 }
  0x9a   : > { %v385_v26 = vmax.f32 %v346_v25, 0.0 }
  0x9c   : > { %v401_v29 = vpack.c.bf16 %v385_v26, %v385_v26 }
  0x9e   : > { %v433_v32 = vunpack.c.l.b16 %v401_v29 }
  0x9f   : > { %v347_v27 = vpop.f32.mrf.mxu0 }
  0xa0   : > { %v348_v28 = vadd.f32 %v347_v27, %v2880_v23 }
  0xa2   : > { %v386_v30 = vmax.f32 %v348_v28, 0.0 }
  0xa4   : > { %v402_v31 = vpack.c.bf16 %v386_v30, %v386_v30 }
  0xa6   : > { %v434_v33 = vunpack.c.l.b16 %v402_v31 }
  0xa7   : > { %v350_v34 = vpop.f32.mrf.mxu0 }
  0xa8   : > { %v2884_v35 = vpack.c.b16 %v434_v33, %v433_v32  ;;  %v351_v36 = vadd.f32 %v350_v34, %v2880_v23 }
  0xaa   : > { %v464_v37 = vshrl.u32 %v2884_v35, 16  ;;  %v466_v38 = vshll.u32 %v2884_v35, 16  ;;  %v387_v41 = vmax.f32 %v351_v36, 0.0  ;;  %v533_v18 = vrot.slane %v2884_v35, 1 }
  0xac   : > { %v617_v39 = vrot.slane %v464_v37, 6  ;;  %v618_v40 = vrot.slane %v466_v38, 7  ;;  %v403_v45 = vpack.c.bf16 %v387_v41, %v387_v41  ;;  %v468_v53 = vrot.slane %v466_v38, 1 }
  0xad   : > { %v561_v54 = vrot.slane %v464_v37, 5  ;;  %v562_v59 = vrot.slane %v466_v38, 6 }
  0xae   : > { %v619_v43 = vor.u32 %v618_v40, %v617_v39  ;;  %v435_v49 = vunpack.c.l.b16 %v403_v45  ;;  %v469_v60 = vor.u32 %v468_v53, %v464_v37 }
  0xaf   : > { %v352_v42 = vpop.f32.mrf.mxu0  ;;  %v563_v4 = vor.u32 %v562_v59, %v561_v54 }
  0xb0   : > { %v353_v44 = vadd.f32 %v352_v42, %v2880_v23 }
  0xb2   : > { %v388_v46 = vmax.f32 %v353_v44, 0.0 }
  0xb4   : > { %v404_v47 = vpack.c.bf16 %v388_v46, %v388_v46 }
  0xb6   : > { %v436_v50 = vunpack.c.l.b16 %v404_v47 }
  0xb7   : > { %v355_v51 = vpop.f32.mrf.mxu0 }
  0xb8   : > { %v2896_v52 = vpack.c.b16 %v436_v50, %v435_v49  ;;  %v356_v56 = vadd.f32 %v355_v51, %v2880_v23 }
  0xba   : > { %v471_v57 = vshll.u32 %v2896_v52, 16  ;;  %v475_v58 = vshrl.u32 %v2896_v52, 16  ;;  %v389_v2 = vmax.f32 %v356_v56, 0.0  ;;  %v534_v16 = vrot.slane %v2896_v52, 1 }
  0xbc   : > { %v473_v61 = vrot.slane %v471_v57, 1  ;;  %v564_v62 = vrot.slane %v475_v58, 5  ;;  %v565_v63 = vrot.slane %v471_v57, 6  ;;  %v620_v0 = vrot.slane %v475_v58, 6 }
  0xbd   : > { %v621_v1 = vrot.slane %v471_v57, 7  ;;  %v686_v8 = vrot.slane %v475_v58, 3  ;;  %v687_v9 = vrot.slane %v471_v57, 4  ;;  %v405_v14 = vpack.c.bf16 %v389_v2, %v389_v2 }
  0xbe   : > { %v474_v3 = vsel %vm462_vm3, %v469_v60, %v473_v61  ;;  %v566_v5 = vor.u32 %v565_v63, %v564_v62  ;;  %v535_v21 = vsel %vm532_vm6, %v533_v18, %v534_v16  ;;  %v477_v31 = vor.u32 %v475_v58, %v473_v61 }
  0xbf   : > { %v357_v6 = vpop.f32.mrf.mxu0  ;;  %518 = vrot.lane.b32.xlu0 %v474_v3, %s2806_s7  ;;  %v622_v7 = vor.u32 %v621_v1, %v620_v0  ;;  %v688_v13 = vor.u32 %v687_v9, %v686_v8  ;;  %v437_v19 = vunpack.c.l.b16 %v405_v14 }
  0xc0   : > { %v358_v10 = vadd.f32 %v357_v6, %v2880_v23  ;;  %v567_v11 = vsel %vm560_vm4, %v563_v4, %v566_v5 }
  0xc1   : > { %588 = vrot.lane.b32.xlu1 %v567_v11, %s2807_s8  ;;  %v2913_v12 = vsel %vm616_vm5, %v619_v43, %v622_v7 }
  0xc2   : > { %v390_v15 = vmax.f32 %v358_v10, 0.0 }
  0xc4   : > { %v406_v17 = vpack.c.bf16 %v390_v15, %v390_v15 }
  0xc6   : > { %v438_v20 = vunpack.c.l.b16 %v406_v17 }
  0xc7   : > { %v360_v24 = vpop.f32.mrf.mxu0  ;;  %546 = vrot.lane.b32.xlu0 %v535_v21, %s2808_s9 }
  0xc8   : > { %v2919_v25 = vpack.c.b16 %v438_v20, %v437_v19  ;;  %v361_v26 = vadd.f32 %v360_v24, %v2880_v23 }
  0xca   : > { %v536_v27 = vrot.slane %v2919_v25, 1  ;;  %v479_v28 = vshll.u32 %v2919_v25, 16  ;;  %v483_v29 = vshrl.u32 %v2919_v25, 16  ;;  %v391_v38 = vmax.f32 %v361_v26, 0.0 }
  0xcb   : > { %v734_v60 = vrot.slane %v2919_v25, 4 }
  0xcc   : > { %v537_v30 = vsel %vm532_vm6, %v534_v16, %v536_v27  ;;  %v481_v32 = vrot.slane %v479_v28, 1  ;;  %v568_v33 = vrot.slane %v483_v29, 5  ;;  %v569_v34 = vrot.slane %v479_v28, 6 }
  0xcd   : > { %548 = vrot.lane.b32.xlu2 %v537_v30, %s2808_s9  ;;  %v689_v36 = vrot.slane %v483_v29, 3  ;;  %v690_v37 = vrot.slane %v479_v28, 4  ;;  %v624_v40 = vrot.slane %v483_v29, 6  ;;  %v625_v43 = vrot.slane %v479_v28, 7 }
  0xce   : > { %v482_v39 = vsel %vm462_vm3, %v477_v31, %v481_v32  ;;  %v570_v45 = vor.u32 %v569_v34, %v568_v33  ;;  %v407_v49 = vpack.c.bf16 %v391_v38, %v391_v38  ;;  %v485_v4 = vor.u32 %v483_v29, %v481_v32 }
  0xcf   : > { %v362_v41 = vpop.f32.mrf.mxu0  ;;  %520 = vrot.lane.b32.xlu1 %v482_v39, %s2806_s7  ;;  %v691_v42 = vor.u32 %v690_v37, %v689_v36  ;;  %v626_v47 = vor.u32 %v625_v43, %v624_v40 }
  0xd0   : > { %v363_v44 = vadd.f32 %v362_v41, %v2880_v23  ;;  %v571_v54 = vsel %vm560_vm4, %v566_v5, %v570_v45  ;;  %v439_v56 = vunpack.c.l.b16 %v407_v49 }
  0xd1   : > { %v2931_v46 = vsel %vm459_vm7, %v688_v13, %v691_v42  ;;  %v2934_v51 = vsel %vm616_vm5, %v622_v7, %v626_v47 }
  0xd2   : > { %v392_v50 = vmax.f32 %v363_v44, 0.0 }
  0xd4   : > { %v408_v53 = vpack.c.bf16 %v392_v50, %v392_v50 }
  0xd5   : > { %590 = vrot.lane.b32.xlu2 %v571_v54, %s2807_s8 }
  0xd6   : > { %v440_v57 = vunpack.c.l.b16 %v408_v53 }
  0xd7   : > { %v365_v58 = vpop.f32.mrf.mxu0 }
  0xd8   : > { %v2938_v59 = vpack.c.b16 %v440_v57, %v439_v56  ;;  %v366_v61 = vadd.f32 %v365_v58, %v2880_v23 }
  0xda   : > { %v736_v62 = vrot.slane %v2938_v59, 4  ;;  %v538_v63 = vrot.slane %v2938_v59, 1  ;;  %v487_v0 = vshll.u32 %v2938_v59, 16  ;;  %v491_v1 = vshrl.u32 %v2938_v59, 16 }
  0xdb   : > { %v393_v9 = vmax.f32 %v366_v61, 0.0 }
  0xdc   : > { %v737_v2 = vsel %vm732_vm9, %v734_v60, %v736_v62  ;;  %v539_v3 = vsel %vm532_vm6, %v536_v27, %v538_v63  ;;  %v489_v5 = vrot.slane %v487_v0, 1  ;;  %v572_v6 = vrot.slane %v491_v1, 5 }
  0xdd   : > { %2449 = vmatmul.msk.bf16.vlgmr.msra.gmra.mxu3 %vm746_vm8, %v737_v2  ;;  %550 = vrot.lane.b32.xlu1 %v539_v3, %s2808_s9  ;;  %v573_v7 = vrot.slane %v487_v0, 6  ;;  %v693_v8 = vrot.slane %v491_v1, 3  ;;  %v694_v11 = vrot.slane %v487_v0, 4  ;;  %v628_v15 = vrot.slane %v491_v1, 6 }
  0xde   : > { %v490_v10 = vsel %vm462_vm3, %v485_v4, %v489_v5  ;;  %v629_v16 = vrot.slane %v487_v0, 7  ;;  %v409_v21 = vpack.c.bf16 %v393_v9, %v393_v9  ;;  %v493_v41 = vor.u32 %v491_v1, %v489_v5 }
  0xdf   : > { %v367_v13 = vpop.f32.mrf.mxu0  ;;  %522 = vrot.lane.b32.xlu0 %v490_v10, %s2806_s7  ;;  %v574_v14 = vor.u32 %v573_v7, %v572_v6  ;;  %v695_v18 = vor.u32 %v694_v11, %v693_v8 }
  0xe0   : > { %v368_v17 = vadd.f32 %v367_v13, %v2880_v23  ;;  %v630_v20 = vor.u32 %v629_v16, %v628_v15  ;;  %v441_v29 = vunpack.c.l.b16 %v409_v21 }
  0xe1   : > { %v575_v19 = vsel %vm560_vm4, %v570_v45, %v574_v14  ;;  %v2958_v26 = vsel %vm459_vm7, %v691_v42, %v695_v18 }
  0xe2   : > { %v394_v24 = vmax.f32 %v368_v17, 0.0  ;;  %592 = vrot.lane.b32.xlu2 %v575_v19, %s2807_s8  ;;  %v2961_v27 = vsel %vm616_vm5, %v626_v47, %v630_v20 }
  0xe4   : > { %v410_v28 = vpack.c.bf16 %v394_v24, %v394_v24 }
  0xe6   : > { %v442_v30 = vunpack.c.l.b16 %v410_v28 }
  0xe7   : > { %v370_v31 = vpop.f32.mrf.mxu0 }
  0xe8   : > { %v2963_v32 = vpack.c.b16 %v442_v30, %v441_v29  ;;  %v371_v33 = vadd.f32 %v370_v31, %v2880_v23  ;;  %v2691_v31 = vld [vmem:[%s3876_s2 + $0x30] sm:$0xff] }
  0xea   : > { %v738_v34 = vrot.slane %v2963_v32, 4  ;;  %v540_v36 = vrot.slane %v2963_v32, 1  ;;  %v495_v37 = vshll.u32 %v2963_v32, 16  ;;  %v499_v38 = vshrl.u32 %v2963_v32, 16 }
  0xeb   : > { %v395_v47 = vmax.f32 %v371_v33, 0.0 }
  0xec   : > { %v739_v39 = vsel %vm732_vm9, %v736_v62, %v738_v34  ;;  %v541_v40 = vsel %vm532_vm6, %v538_v63, %v540_v36  ;;  %v497_v42 = vrot.slane %v495_v37, 1  ;;  %v576_v43 = vrot.slane %v499_v38, 5 }
  0xed   : > { %2450 = vmatmul.msk.bf16.gmra.mxu3 %vm746_vm8, %v739_v39  ;;  %552 = vrot.lane.b32.xlu1 %v541_v40, %s2808_s9  ;;  %v577_v44 = vrot.slane %v495_v37, 6  ;;  %v697_v45 = vrot.slane %v499_v38, 3  ;;  %v698_v50 = vrot.slane %v495_v37, 4  ;;  %v632_v56 = vrot.slane %v499_v38, 6 }
  0xee   : > { %v498_v49 = vsel %vm462_vm3, %v493_v41, %v497_v42  ;;  %v633_v57 = vrot.slane %v495_v37, 7  ;;  %v411_v0 = vpack.c.bf16 %v395_v47, %v395_v47 }
  0xef   : > { %v372_v53 = vpop.f32.mrf.mxu0  ;;  %524 = vrot.lane.b32.xlu0 %v498_v49, %s2806_s7  ;;  %v578_v54 = vor.u32 %v577_v44, %v576_v43  ;;  %v2977_v61 = vor.u32 %v698_v50, %v697_v45  ;;  %v2689_v43 = vld [vmem:[%s3876_s2 + $0x20] sm:$0xff] }
  0xf0   : > { %v373_v58 = vadd.f32 %v372_v53, %v2880_v23  ;;  %v2980_v63 = vor.u32 %v633_v57, %v632_v56  ;;  %v443_v5 = vunpack.c.l.b16 %v411_v0  ;;  %v2688_v53 = vld [vmem:[%s3876_s2 + $0x18] sm:$0xff] }
  0xf1   : > { %v579_v62 = vsel %vm560_vm4, %v574_v14, %v578_v54  ;;  %v2985_v2 = vsel %vm459_vm7, %v695_v18, %v2977_v61  ;;  %v2692_v14 = vld [vmem:[%s3876_s2 + $0x38] sm:$0xff]  ;;  %v501_v18 = vor.u32 %v499_v38, %v497_v42  ;;  %v2690_v38 = vld [vmem:[%s3876_s2 + $0x28] sm:$0xff] }
  0xf2   : > { %v396_v1 = vmax.f32 %v373_v58, 0.0  ;;  %594 = vrot.lane.b32.xlu2 %v579_v62, %s2807_s8  ;;  %v2989_v3 = vsel %vm616_vm5, %v630_v20, %v2980_v63  ;;  %1020 = vmatpush.bf16.msra.mxu1 %v2692_v14  ;;  %v660_v14 = vrot.slane %v2919_v25, 3 }
  0xf4   : > { %v412_v4 = vpack.c.bf16 %v396_v1, %v396_v1 }
  0xf6   : > { %v444_v6 = vunpack.c.l.b16 %v412_v4  ;;  %1021 = vmatpush.bf16.msra.mxu1 %v2691_v31 }
  0xf7   : > { %v375_v7 = vpop.f32.mrf.mxu0 }
  0xf8   : > { %v2991_v8 = vpack.c.b16 %v444_v6, %v443_v5  ;;  %v376_v9 = vadd.f32 %v375_v7, %v2880_v23 }
  0xfa   : > { %v740_v10 = vrot.slane %v2991_v8, 4  ;;  %v542_v11 = vrot.slane %v2991_v8, 1  ;;  %v2997_v13 = vshll.u32 %v2991_v8, 16  ;;  %v3003_v15 = vshrl.u32 %v2991_v8, 16  ;;  %1022 = vmatpush.bf16.msra.mxu1 %v2690_v38 }
  0xfb   : > { %v397_v24 = vmax.f32 %v376_v9, 0.0  ;;  %v2687_v9 = vld [vmem:[%s3876_s2 + $0x10] sm:$0xff] }
  0xfc   : > { %v741_v16 = vsel %vm732_vm9, %v738_v34, %v740_v10  ;;  %v543_v17 = vsel %vm532_vm6, %v540_v36, %v542_v11  ;;  %v505_v19 = vrot.slane %v2997_v13, 1  ;;  %v580_v20 = vrot.slane %v3003_v15, 5 }
  0xfd   : > { %2451 = vmatmul.msk.bf16.gmra.mxu3 %vm746_vm8, %v741_v16  ;;  %554 = vrot.lane.b32.xlu1 %v543_v17, %s2808_s9  ;;  %v581_v21 = vrot.slane %v2997_v13, 6  ;;  %v413_v36 = vpack.c.bf16 %v397_v24, %v397_v24  ;;  %v701_v38 = vrot.slane %v3003_v15, 3 }
  0xfe   : > { %v506_v28 = vsel %vm462_vm3, %v501_v18, %v505_v19  ;;  %1023 = vmatpush.bf16.msra.mxu1 %v2689_v43  ;;  %v659_v18 = vrot.slane %v2896_v52, 3 }
  0xff   : > { %v377_v29 = vpop.f32.mrf.mxu0  ;;  %526 = vrot.lane.b32.xlu0 %v506_v28, %s2806_s7  ;;  %v582_v30 = vor.u32 %v581_v21, %v580_v20  ;;  %v445_v40 = vunpack.c.l.b16 %v413_v36  ;;  %v2685_v28 = vld [vmem:[%s3876_s2] sm:$0xff] }
 0x100   : > { %v378_v33 = vadd.f32 %v377_v29, %v2880_v23  ;;  %v661_v24 = vsel %vm329_vm0, %v659_v18, %v660_v14 }
 0x101   : > { %v583_v34 = vsel %vm560_vm4, %v578_v54, %v582_v30  ;;  %v509_v54 = vor.u32 %v3003_v15, %v505_v19  ;;  %v2686_v19 = vld [vmem:[%s3876_s2 + $0x8] sm:$0xff] }
 0x102   : > { %v398_v37 = vmax.f32 %v378_v33, 0.0  ;;  %596 = vrot.lane.b32.xlu2 %v583_v34, %s2807_s8  ;;  %1024 = vmatpush.bf16.msra.mxu1 %v2688_v53  ;;  %v662_v34 = vrot.slane %v2938_v59, 3 }
 0x104   : > { %v414_v39 = vpack.c.bf16 %v398_v37, %v398_v37 }
 0x106   : > { %v446_v41 = vunpack.c.l.b16 %v414_v39  ;;  %1025 = vmatpush.bf16.msra.mxu1 %v2687_v9 }
 0x107   : > { %v380_v42 = vpop.f32.mrf.mxu0 }
 0x108   : > { %v3026_v44 = vpack.c.b16 %v446_v41, %v445_v40  ;;  %v381_v45 = vadd.f32 %v380_v42, %v2880_v23  ;;  %v636_v40 = vrot.slane %v3003_v15, 6  ;;  %v637_v41 = vrot.slane %v2997_v13, 7 }
 0x10a   : > { %v742_v47 = vrot.slane %v3026_v44, 4  ;;  %v544_v49 = vrot.slane %v3026_v44, 1  ;;  %v3032_v50 = vshll.u32 %v3026_v44, 16  ;;  %v3039_v56 = vshrl.u32 %v3026_v44, 16  ;;  %1026 = vmatpush.bf16.msra.mxu1 %v2686_v19  ;;  %v2700_v19 = vld [vmem:[%s3876_s2 + $0x78] sm:$0xff] }
 0x10b   : > { %v399_v57 = vmax.f32 %v381_v45, 0.0  ;;  %1063 = vmatpush.bf16.msra.mxu2 %v2700_v19 }
 0x10c   : > { %v743_v58 = vsel %vm732_vm9, %v740_v10, %v742_v47  ;;  %v545_v62 = vsel %vm532_vm6, %v542_v11, %v544_v49  ;;  %v513_v0 = vrot.slane %v3032_v50, 1  ;;  %v584_v1 = vrot.slane %v3039_v56, 5 }
 0x10d   : > { %2452 = vmatmul.msk.bf16.gmra.mxu3 %vm746_vm8, %v743_v58  ;;  %556 = vrot.lane.b32.xlu1 %v545_v62, %s2808_s9  ;;  %v585_v4 = vrot.slane %v3032_v50, 6  ;;  %v415_v10 = vpack.c.bf16 %v399_v57, %v399_v57  ;;  %v705_v45 = vrot.slane %v3039_v56, 3  ;;  %v706_v15 = vrot.slane %v3032_v50, 4 }
 0x10e   : > { %v514_v5 = vsel %vm462_vm3, %v509_v54, %v513_v0  ;;  %1027 = vmatpush.bf16.msra.mxu1 %v2685_v28  ;;  %v640_v62 = vrot.slane %v3039_v56, 6 }
 0x10f   : > { %v382_v6 = vpop.f32.mrf.mxu0  ;;  %528 = vrot.lane.b32.xlu0 %v514_v5, %s2806_s7  ;;  %v586_v7 = vor.u32 %v585_v4, %v584_v1  ;;  %v447_v20 = vunpack.c.l.b16 %v415_v10  ;;  %v707_v54 = vor.u32 %v706_v15, %v705_v45 }
 0x110   : > { %v383_v11 = vadd.f32 %v382_v6, %v2880_v23 }
 0x111   : > { %v587_v16 = vsel %vm560_vm4, %v582_v30, %v586_v7 }
 0x112   : > { %v400_v17 = vmax.f32 %v383_v11, 0.0  ;;  %598 = vrot.lane.b32.xlu2 %v587_v16, %s2807_s8  ;;  %1112 = vmatpush.bf16.msrb.mxu1 %v2893_v48  ;;  %v664_v48 = vrot.slane %v2963_v32, 3 }
 0x114   : > { %v416_v21 = vpack.c.bf16 %v400_v17, %v400_v17  ;;  %v665_v36 = vsel %vm329_vm0, %v662_v34, %v664_v48 }
 0x115   : > { %672 = vrot.lane.b32.xlu1 %v661_v24, %s2808_s9  ;;  %v2698_v24 = vld [vmem:[%s3876_s2 + $0x68] sm:$0xff] }
 0x116   : > { %v448_v23 = vunpack.c.l.b16 %v416_v21  ;;  %1113 = vmatpush.bf16.msrb.mxu1 %v2901_v55  ;;  %v666_v55 = vrot.slane %v2991_v8, 3  ;;  %v2699_v21 = vld [vmem:[%s3876_s2 + $0x70] sm:$0xff] }
 0x117   : > { %644 = vrot.lane.b32.xlu0 %v2913_v12, %s2806_s7  ;;  %v517_v12 = vor.u32 %v3039_v56, %v513_v0  ;;  %v641_v0 = vrot.slane %v3032_v50, 7  ;;  %1064 = vmatpush.bf16.msra.mxu2 %v2699_v21 }
 0x118   : > { %v456_v29 = vpack.c.b16 %v448_v23, %v447_v20 }
 0x119   : > { %v642_v10 = vor.u32 %v641_v0, %v640_v62  ;;  %v603_v62 = vrot.slane %v2884_v35, 6 }
 0x11a   : > { %v3070_v30 = vsel %vm460_vm10, %v456_v29, 0  ;;  %718 = vrot.lane.b32.xlu2 %v2931_v46, %s2807_s8  ;;  %v663_v46 = vsel %vm329_vm0, %v660_v14, %v662_v34 }
 0x11b   : > { %v744_v31 = vrot.slane %v3070_v30, 4  ;;  %v713_v57 = vshll.u32 %v3070_v30, 16  ;;  %v670_v4 = vrot.slane %v3070_v30, 3  ;;  %1065 = vmatpush.bf16.msra.mxu2 %v2698_v24 }
 0x11d   : > { %558 = vrot.lane.b32.xlu1 %v544_v49, %s2808_s9  ;;  %v745_v33 = vsel %vm732_vm9, %v742_v47, %v744_v31 }
 0x11e   : > { %2453 = vmatmul.msk.bf16.gmra.mxu3 %vm746_vm8, %v745_v33 }
 0x11f   : > { %530 = vrot.lane.b32.xlu0 %v517_v12, %s2806_s7  ;;  %v2696_v12 = vld [vmem:[%s3876_s2 + $0x58] sm:$0xff] }
 0x122   : > { %600 = vrot.lane.b32.xlu2 %v586_v7, %s2807_s8  ;;  %v715_v7 = vrot.slane %v713_v57, 4 }
 0x125   : > { %674 = vrot.lane.b32.xlu1 %v663_v46, %s2808_s9 }
 0x127   : > { %646 = vrot.lane.b32.xlu0 %v2934_v51, %s2806_s7  ;;  %v702_v51 = vrot.slane %v2997_v13, 4  ;;  %v638_v13 = vor.u32 %v637_v41, %v636_v40  ;;  %v549_v1 = vpop.permute.xlu2 %548 }
 0x129   : > { %v703_v39 = vor.u32 %v702_v51, %v701_v38  ;;  %v639_v58 = vsel %vm616_vm5, %v2980_v63, %v638_v13  ;;  %v643_v56 = vsel %vm616_vm5, %v638_v13, %v642_v10 }
 0x12a   : > { %720 = vrot.lane.b32.xlu2 %v2958_v26, %s2807_s8  ;;  %v667_v26 = vsel %vm329_vm0, %v664_v48, %v666_v55  ;;  %v2695_v48 = vld [vmem:[%s3876_s2 + $0x50] sm:$0xff] }
 0x12b   : > { %v708_v5 = vsel %vm459_vm7, %v703_v39, %v707_v54 }
 0x12d   : > { %676 = vrot.lane.b32.xlu1 %v665_v36, %s2808_s9  ;;  %v2694_v36 = vld [vmem:[%s3876_s2 + $0x48] sm:$0xff] }
 0x12e   : > { %2454 = vmatmul.msk.bf16.gmra.mxu3 %vm746_vm8, %v744_v31 }
 0x12f   : > { %648 = vrot.lane.b32.xlu0 %v2961_v27, %s2806_s7  ;;  %v668_v27 = vrot.slane %v3026_v44, 3  ;;  %v591_v17 = vpop.permute.xlu2 %590 }
 0x131   : > { %v519_v37 = vpop.permute.xlu0 %518  ;;  %v669_v53 = vsel %vm329_vm0, %v666_v55, %v668_v27  ;;  %v671_v11 = vsel %vm329_vm0, %v668_v27, %v670_v4 }
 0x132   : > { %722 = vrot.lane.b32.xlu2 %v2985_v2, %s2807_s8  ;;  %v748_v42 = vsel %vm746_vm8, %v2884_v35, %v519_v37  ;;  %v704_v2 = vsel %vm459_vm7, %v2977_v61, %v703_v39  ;;  %v710_v61 = vshrl.u32 %v3070_v30, 16  ;;  %v2697_v30 = vld [vmem:[%s3876_s2 + $0x60] sm:$0xff] }
 0x133   : > { %v589_v47 = vpop.permute.xlu1 %588  ;;  %1066 = vmatpush.bf16.msra.mxu2 %v2697_v30  ;;  %v2693_v39 = vld [vmem:[%s3876_s2 + $0x40] sm:$0xff]  ;;  %v608_v30 = vrot.slane %v2938_v59, 6 }
 0x134   : > { %v712_v6 = vrot.slane %v710_v61, 3  ;;  %v604_v61 = vrot.slane %v2896_v52, 6 }
 0x135   : > { %678 = vrot.lane.b32.xlu1 %v667_v26, %s2808_s9 }
 0x136   : > { %v716_v50 = vor.u32 %v715_v7, %v712_v6 }
 0x137   : > { %650 = vrot.lane.b32.xlu0 %v2989_v3, %s2806_s7  ;;  %1067 = vmatpush.bf16.msra.mxu2 %v2696_v12 }
 0x138   : > { %v717_v16 = vsel %vm459_vm7, %v707_v54, %v716_v50 }
 0x139   : > { %v547_v43 = vpop.permute.xlu0 %546 }
 0x13a   : > { %724 = vrot.lane.b32.xlu2 %v704_v2, %s2807_s8  ;;  %v763_v3 = vsel %vm761_vm11, %v748_v42, %v547_v43 }
 0x13b   : > { %v778_v49 = vsel %vm776_vm12, %v763_v3, %v589_v47  ;;  %1068 = vmatpush.bf16.msra.mxu2 %v2695_v48  ;;  %v733_v48 = vrot.slane %v2896_v52, 4 }
 0x13c   : > { %1028 = vmatmul.bf16.vlgmr.msra.gmra.mxu1 %v778_v49  ;;  %v593_v31 = vpop.permute.xlu2 %592 }
 0x13d   : > { %680 = vrot.lane.b32.xlu1 %v669_v53, %s2808_s9 }
 0x13f   : > { %652 = vrot.lane.b32.xlu0 %v639_v58, %s2806_s7  ;;  %1069 = vmatpush.bf16.msra.mxu2 %v2694_v36 }
 0x141   : > { %v521_v9 = vpop.permute.xlu1 %520 }
 0x142   : > { %726 = vrot.lane.b32.xlu2 %v708_v5, %s2807_s8  ;;  %v750_v63 = vsel %vm746_vm8, %v2896_v52, %v521_v9 }
 0x143   : > { %v765_v14 = vsel %vm761_vm11, %v750_v63, %v549_v1  ;;  %1070 = vmatpush.bf16.msra.mxu2 %v2693_v39  ;;  %v605_v1 = vsel %vm602_vm13, %v603_v62, %v604_v61 }
 0x144   : > { %v781_v18 = vsel %vm776_vm12, %v765_v14, %v591_v17 }
 0x145   : > { %682 = vrot.lane.b32.xlu1 %v671_v11, %s2808_s9 }
 0x147   : > { %654 = vrot.lane.b32.xlu0 %v643_v56, %s2806_s7  ;;  %v606_v56 = vrot.slane %v2919_v25, 6 }
 0x149   : > { %v607_v17 = vsel %vm602_vm13, %v604_v61, %v606_v56 }
 0x14a   : > { %728 = vrot.lane.b32.xlu2 %v717_v16, %s2807_s8 }
 0x14c   : > { %1033 = vmatmul.bf16.gmra.mxu1 %v781_v18  ;;  %v595_v26 = vpop.permute.xlu2 %594 }
 0x14d   : > { %684 = vrot.lane.b32.xlu1 %v670_v4, %s2808_s9 }
 0x14f   : > { %656 = vrot.lane.b32.xlu0 %v642_v10, %s2806_s7  ;;  %v551_v28 = vpop.permute.xlu1 %550 }
 0x151   : > { %v523_v20 = vpop.permute.xlu0 %522 }
 0x152   : > { %730 = vrot.lane.b32.xlu2 %v716_v50, %s2807_s8  ;;  %v752_v23 = vsel %vm746_vm8, %v2919_v25, %v523_v20 }
 0x153   : > { %v767_v29 = vsel %vm761_vm11, %v752_v23, %v551_v28 }
 0x154   : > { %v784_v33 = vsel %vm776_vm12, %v767_v29, %v593_v31 }
 0x15c   : > { %1038 = vmatmul.bf16.gmra.mxu1 %v784_v33  ;;  %v597_v42 = vpop.permute.xlu2 %596  ;;  %v609_v33 = vsel %vm602_vm13, %v606_v56, %v608_v30 }
 0x15f   : > { %v553_v37 = vpop.permute.xlu1 %552 }
 0x160   : > { %v3161_v34 = vpop.f32.mrf.mxu3 }
 0x161   : > { %v525_v46 = vpop.permute.xlu0 %524 }
 0x162   : > { %v754_v55 = vsel %vm746_vm8, %v2938_v59, %v525_v46 }
 0x163   : > { %v769_v51 = vsel %vm761_vm11, %v754_v55, %v553_v37 }
 0x164   : > { %v787_v40 = vsel %vm776_vm12, %v769_v51, %v595_v26  ;;  %v735_v51 = vsel %vm732_vm9, %v733_v48, %v734_v60  ;;  %v610_v26 = vrot.slane %v2963_v32, 6 }
 0x166   : > { %v611_v52 = vsel %vm602_vm13, %v608_v30, %v610_v26 }
 0x168   : > { %v3171_v38 = vpop.f32.mrf.mxu3 }
 0x16c   : > { %1043 = vmatmul.bf16.gmra.mxu1 %v787_v40  ;;  %v599_v3 = vpop.permute.xlu2 %598 }
 0x16f   : > { %v555_v43 = vpop.permute.xlu1 %554 }
 0x170   : > { %v3178_v41 = vpop.f32.mrf.mxu3 }
 0x171   : > { %v527_v27 = vpop.permute.xlu0 %526 }
 0x172   : > { %v756_v2 = vsel %vm746_vm8, %v2963_v32, %v527_v27 }
 0x173   : > { %v771_v45 = vsel %vm761_vm11, %v756_v2, %v555_v43 }
 0x174   : > { %v790_v47 = vsel %vm776_vm12, %v771_v45, %v597_v42  ;;  %v719_v57 = vpop.permute.xlu2 %718 }
 0x178   : > { %v3183_v15 = vpop.f32.mrf.mxu3 }
 0x17c   : > { %1048 = vmatmul.bf16.gmra.mxu1 %v790_v47  ;;  %v601_v63 = vpop.permute.xlu2 %600  ;;  %v612_v47 = vrot.slane %v2991_v8, 6 }
 0x17f   : > { %v557_v13 = vpop.permute.xlu1 %556 }
 0x180   : > { %v3186_v53 = vpop.f32.mrf.mxu3 }
 0x181   : > { %v529_v49 = vpop.permute.xlu0 %528 }
 0x182   : > { %v758_v54 = vsel %vm746_vm8, %v2991_v8, %v529_v49 }
 0x183   : > { %v773_v0 = vsel %vm761_vm11, %v758_v54, %v557_v13  ;;  %v613_v13 = vsel %vm602_vm13, %v610_v26, %v612_v47 }
 0x184   : > { %v793_v6 = vsel %vm776_vm12, %v773_v0, %v599_v3  ;;  %v721_v21 = vpop.permute.xlu2 %720 }
 0x187   : > { %v673_v58 = vpop.permute.xlu1 %672 }
 0x188   : > { %v3198_v10 = vpop.f32.mrf.mxu3 }
 0x189   : > { %v645_v4 = vpop.permute.xlu0 %644 }
 0x18a   : > { %v800_v5 = vsel %vm746_vm8, %v605_v1, %v645_v4  ;;  %v614_v1 = vrot.slane %v3026_v44, 6 }
 0x18b   : > { %v820_v7 = vsel %vm761_vm11, %v800_v5, %v673_v58 }
 0x18c   : > { %1053 = vmatmul.bf16.gmra.mxu1 %v793_v6  ;;  %v834_v9 = vsel %vm776_vm12, %v820_v7, %v719_v57  ;;  %v723_v55 = vpop.permute.xlu2 %722  ;;  %v615_v8 = vsel %vm602_vm13, %v612_v47, %v614_v1 }
 0x18d   : > { %1071 = vmatmul.bf16.vlgmr.msra.gmra.mxu2 %v834_v9 }
 0x18f   : > { %v559_v11 = vpop.permute.xlu1 %558 }
 0x190   : > { %v3203_v14 = vpop.f32.mrf.mxu3 }
 0x191   : > { %v531_v35 = vpop.permute.xlu0 %530 }
 0x192   : > { %v760_v50 = vsel %vm746_vm8, %v3026_v44, %v531_v35 }
 0x193   : > { %v775_v16 = vsel %vm761_vm11, %v760_v50, %v559_v11 }
 0x194   : > { %v796_v24 = vsel %vm776_vm12, %v775_v16, %v601_v63  ;;  %v725_v43 = vpop.permute.xlu2 %724 }
 0x197   : > { %v675_v19 = vpop.permute.xlu1 %674 }
 0x198   : > { %v3211_v29 = vpop.f32.mrf.mxu3 }
 0x199   : > { %v647_v18 = vpop.permute.xlu0 %646 }
 0x19a   : > { %v803_v20 = vsel %vm746_vm8, %v607_v17, %v647_v18 }
 0x19b   : > { %v822_v23 = vsel %vm761_vm11, %v803_v20, %v675_v19 }
 0x19c   : > { %1058 = vmatmul.bf16.gmra.mxu1 %v796_v24  ;;  %v837_v28 = vsel %vm776_vm12, %v822_v23, %v721_v21  ;;  %v727_v62 = vpop.permute.xlu2 %726 }
 0x19d   : > { %1076 = vmatmul.bf16.gmra.mxu2 %v837_v28 }
 0x19f   : > { %v677_v46 = vpop.permute.xlu1 %676 }
 0x1a1   : > { %v649_v31 = vpop.permute.xlu0 %648  ;;  %v3218_v37 = vpop.f32.mrf.mxu3 }
 0x1a2   : > { %v806_v12 = vsel %vm746_vm8, %v609_v33, %v649_v31 }
 0x1a3   : > { %v824_v36 = vsel %vm761_vm11, %v806_v12, %v677_v46  ;;  %v3262_v46 = vperm.slane %v2877_v22, 1 }
 0x1a4   : > { %v840_v59 = vsel %vm776_vm12, %v824_v36, %v723_v55  ;;  %v729_v63 = vpop.permute.xlu2 %728 }
 0x1a7   : > { %v679_v42 = vpop.permute.xlu1 %678 }
 0x1a9   : > { %v651_v39 = vpop.permute.xlu0 %650  ;;  %v3226_v40 = vpop.f32.mrf.mxu3 }
 0x1aa   : > { %v809_v27 = vsel %vm746_vm8, %v611_v52, %v651_v39  ;;  %v2719_v52 = vld [vmem:[%s3876_s2 + $0x110] sm:$0xff] }
 0x1ab   : > { %v826_v25 = vsel %vm761_vm11, %v809_v27, %v679_v42 }
 0x1ac   : > { %2448 = vmatmul.msk.bf16.vlgmr.msrb.gmra.mxu1 %vm746_vm8, %v735_v51  ;;  %v843_v60 = vsel %vm776_vm12, %v826_v25, %v725_v43  ;;  %v731_v19 = vpop.permute.xlu2 %730 }
 0x1ad   : > { %1081 = vmatmul.bf16.gmra.mxu2 %v840_v59  ;;  %v2720_v59 = vld [vmem:[%s3876_s2 + $0x118] sm:$0xff] }
 0x1ae   : > { %1742 = vmatpush.bf16.msra.mxu1 %v2720_v59 }
 0x1af   : > { %v681_v61 = vpop.permute.xlu1 %680 }
 0x1b1   : > { %v3232_v45 = vpop.f32.mrf.mxu3  ;;  %v653_v3 = vpop.permute.xlu0 %652 }
 0x1b2   : > { %v812_v54 = vsel %vm746_vm8, %v613_v13, %v653_v3  ;;  %1743 = vmatpush.bf16.msra.mxu1 %v2719_v52 }
 0x1b3   : > { %v828_v58 = vsel %vm761_vm11, %v812_v54, %v681_v61 }
 0x1b4   : > { %v846_v0 = vsel %vm776_vm12, %v828_v58, %v727_v62 }
 0x1b7   : > { %v683_v7 = vpop.permute.xlu1 %682 }
 0x1b9   : > { %v1029_v2 = vpop.f32.mrf.mxu1  ;;  %v1147_v49 = vpop.f32.mrf.mxu3 }
 0x1ba   : > { %v655_v5 = vpop.permute.xlu0 %654  ;;  %v1030_v22 = vadd.f32 %v1029_v2, %v3262_v46 }
 0x1bb   : > { %v815_v6 = vsel %vm746_vm8, %v615_v8, %v655_v5 }
 0x1bc   : > { %v830_v11 = vsel %vm761_vm11, %v815_v6, %v683_v7 }
 0x1bd   : > { %1086 = vmatmul.bf16.gmra.mxu2 %v843_v60  ;;  %v849_v35 = vsel %vm776_vm12, %v830_v11, %v729_v63  ;;  %v2718_v60 = vld [vmem:[%s3876_s2 + $0x108] sm:$0xff] }
 0x1be   : > { %1702 = vmatpush.bf16.msrb.mxu0 %v2718_v60 }
 0x1bf   : > { %v685_v17 = vpop.permute.xlu1 %684 }
 0x1c1   : > { %v1031_v32 = vpop.f32.mrf.mxu1 }
 0x1c2   : > { %v657_v56 = vpop.permute.xlu0 %656  ;;  %v1032_v54 = vadd.f32 %v1031_v32, %v3262_v46 }
 0x1c3   : > { %v818_v16 = vsel %vm746_vm8, %v614_v1, %v657_v56 }
 0x1c4   : > { %v832_v44 = vsel %vm761_vm11, %v818_v16, %v685_v17 }
 0x1c5   : > { %v852_v20 = vsel %vm776_vm12, %v832_v44, %v731_v19 }
 0x1c9   : > { %v1034_v57 = vpop.f32.mrf.mxu1 }
 0x1ca   : > { %v1035_v48 = vadd.f32 %v1034_v57, %v3262_v46 }
 0x1cd   : > { %1091 = vmatmul.bf16.gmra.mxu2 %v846_v0 }
 0x1d1   : > { %v1036_v4 = vpop.f32.mrf.mxu1 }
 0x1d2   : > { %v1037_v39 = vadd.f32 %v1036_v4, %v3262_v46 }
 0x1d9   : > { %v1039_v9 = vpop.f32.mrf.mxu1 }
 0x1da   : > { %v1040_v2 = vadd.f32 %v1039_v9, %v3262_v46 }
 0x1dd   : > { %1096 = vmatmul.bf16.gmra.mxu2 %v849_v35 }
 0x1e1   : > { %v1041_v50 = vpop.f32.mrf.mxu1 }
 0x1e2   : > { %v1042_v32 = vadd.f32 %v1041_v50, %v3262_v46 }
 0x1e9   : > { %v3246_v18 = vpop.f32.mrf.mxu1 }
 0x1ed   : > { %1101 = vmatmul.bf16.gmra.mxu2 %v852_v20  ;;  %v2717_v20 = vld [vmem:[%s3876_s2 + $0x100] sm:$0xff] }
 0x1ee   : > { %1703 = vmatpush.bf16.msrb.mxu0 %v2717_v20 }
 0x1f1   : > { %v3249_v21 = vpop.f32.mrf.mxu1 }
 0x1f9   : > { %v3251_v24 = vpop.f32.mrf.mxu1 }
 0x201   : > { %v3253_v23 = vpop.f32.mrf.mxu1 }
 0x209   : > { %v3255_v28 = vpop.f32.mrf.mxu1 }
 0x210   : > { %v1072_v30 = vpop.f32.mrf.mxu2 }
 0x211   : > { %v3257_v31 = vpop.f32.mrf.mxu1  ;;  %v1073_v47 = vadd.f32 %v1072_v30, %v1030_v22 }
 0x218   : > { %v1074_v33 = vpop.f32.mrf.mxu2 }
 0x219   : > { %v3259_v12 = vpop.f32.mrf.mxu1  ;;  %v1075_v57 = vadd.f32 %v1074_v33, %v1032_v54 }
 0x220   : > { %v1077_v36 = vpop.f32.mrf.mxu2 }
 0x221   : > { %v1078_v55 = vadd.f32 %v1077_v36, %v1035_v48  ;;  %v1061_v51 = vpop.f32.mrf.mxu1 }
 0x223   : > { %v1121_v26 = vadd.f32 %v3161_v34, %v1078_v55 }
 0x225   : > { %v1151_v42 = vmax.f32 %v1121_v26, 0.0 }
 0x227   : > { %v1164_v13 = vpack.c.bf16 %v1151_v42, %v1151_v42 }
 0x228   : > { %v1079_v27 = vpop.f32.mrf.mxu2 }
 0x229   : > { %v1080_v25 = vadd.f32 %v1079_v27, %v1037_v39  ;;  %v1115_v43 = vpop.f32.mrf.mxu1  ;;  %v1190_v0 = vunpack.c.l.b16 %v1164_v13  ;;  %v1045_v27 = vadd.f32 %v3246_v18, %v3262_v46 }
 0x22a   : > { %v1116_v3 = vadd.f32 %v1115_v43, %v1073_v47 }
 0x22b   : > { %v1123_v34 = vadd.f32 %v3171_v38, %v1080_v25 }
 0x22c   : > { %v1149_v58 = vmax.f32 %v1116_v3, 0.0 }
 0x22d   : > { %v1152_v49 = vmax.f32 %v1123_v34, 0.0 }
 0x22e   : > { %v1162_v38 = vpack.c.bf16 %v1149_v58, %v1149_v58  ;;  %v2710_v58 = vld [vmem:[%s3876_s2 + $0xc8] sm:$0xff] }
 0x22f   : > { %v1165_v61 = vpack.c.bf16 %v1152_v49, %v1152_v49  ;;  %1668 = vmatpush.bf16.msrb.mxu3 %v2710_v58 }
 0x230   : > { %v1082_v62 = vpop.f32.mrf.mxu2  ;;  %v1188_v35 = vunpack.c.l.b16 %v1162_v38 }
 0x231   : > { %v1191_v1 = vunpack.c.l.b16 %v1165_v61  ;;  %v1083_v4 = vadd.f32 %v1082_v62, %v1040_v2  ;;  %v1117_v5 = vpop.f32.mrf.mxu1 }
 0x232   : > { %v1118_v8 = vadd.f32 %v1117_v5, %v1075_v57 }
 0x233   : > { %v3280_v6 = vpack.c.b16 %v1191_v1, %v1190_v0  ;;  %v1126_v11 = vadd.f32 %v3178_v41, %v1083_v4 }
 0x234   : > { %v1150_v7 = vmax.f32 %v1118_v8, 0.0 }
 0x235   : > { %v3285_v9 = vshrl.u32 %v3280_v6, 16  ;;  %v3288_v17 = vshll.u32 %v3280_v6, 16  ;;  %v1153_v44 = vmax.f32 %v1126_v11, 0.0  ;;  %v1261_v50 = vrot.slane %v3280_v6, 1 }
 0x236   : > { %v1163_v63 = vpack.c.bf16 %v1150_v7, %v1150_v7  ;;  %v1421_v62 = vrot.slane %v3280_v6, 4  ;;  %v1362_v0 = vrot.slane %v3280_v6, 3 }
 0x237   : > { %v1282_v33 = vrot.slane %v3285_v9, 5  ;;  %v1283_v51 = vrot.slane %v3288_v17, 6  ;;  %v1166_v59 = vpack.c.bf16 %v1153_v44, %v1153_v44  ;;  %v1221_v34 = vrot.slane %v3288_v17, 1 }
 0x238   : > { %v1189_v56 = vunpack.c.l.b16 %v1163_v63  ;;  %v1084_v16 = vpop.f32.mrf.mxu2  ;;  %v1331_v1 = vrot.slane %v3285_v9, 6  ;;  %v1332_v4 = vrot.slane %v3288_v17, 7 }
 0x239   : > { %v1085_v19 = vadd.f32 %v1084_v16, %v1042_v32  ;;  %v3308_v60 = vor.u32 %v1283_v51, %v1282_v33  ;;  %v1192_v3 = vunpack.c.l.b16 %v1166_v59  ;;  %v1383_v32 = vrot.slane %v3285_v9, 3 }
 0x23a   : > { %v3293_v30 = vpack.c.b16 %v1189_v56, %v1188_v35  ;;  %v1384_v35 = vrot.slane %v3288_v17, 4  ;;  %v1047_v56 = vadd.f32 %v3249_v21, %v3262_v46  ;;  %v1333_v20 = vor.u32 %v1332_v4, %v1331_v1  ;;  %v2716_v21 = vld [vmem:[%s3876_s2 + $0xf8] sm:$0xff]  ;;  %v2709_v17 = vld [vmem:[%s3876_s2 + $0xc0] sm:$0xff] }
 0x23b   : > { %v1128_v41 = vadd.f32 %v3183_v15, %v1085_v19  ;;  %1704 = vmatpush.bf16.msrb.mxu0 %v2716_v21  ;;  %1669 = vmatpush.bf16.msrb.mxu3 %v2709_v17  ;;  %v1055_v21 = vadd.f32 %v3255_v28, %v3262_v46  ;;  %v2714_v28 = vld [vmem:[%s3876_s2 + $0xe8] sm:$0xff] }
 0x23c   : > { %v1260_v48 = vrot.slane %v3293_v30, 1  ;;  %v1212_v36 = vshrl.u32 %v3293_v30, 16  ;;  %v1214_v55 = vshll.u32 %v3293_v30, 16 }
 0x23d   : > { %v1154_v26 = vmax.f32 %v1128_v41, 0.0 }
 0x23e   : > { %v1262_v39 = vsel %vm532_vm6, %v1260_v48, %v1261_v50  ;;  %v1279_v15 = vrot.slane %v1212_v36, 5  ;;  %v1280_v52 = vrot.slane %v1214_v55, 6  ;;  %v1216_v22 = vrot.slane %v1214_v55, 1 }
 0x23f   : > { %v1167_v42 = vpack.c.bf16 %v1154_v26, %v1154_v26  ;;  %1269 = vrot.lane.b32.xlu1 %v1262_v39, %s2808_s9  ;;  %v1328_v61 = vrot.slane %v1212_v36, 6  ;;  %v1329_v18 = vrot.slane %v1214_v55, 7  ;;  %v1385_v55 = vor.u32 %v1384_v35, %v1383_v32 }
 0x240   : > { %v1087_v25 = vpop.f32.mrf.mxu2  ;;  %v1281_v43 = vor.u32 %v1280_v52, %v1279_v15  ;;  %v1217_v47 = vor.u32 %v1216_v22, %v1212_v36 }
 0x241   : > { %v1193_v13 = vunpack.c.l.b16 %v1167_v42  ;;  %v1088_v49 = vadd.f32 %v1087_v25, %v1045_v27  ;;  %v1330_v11 = vor.u32 %v1329_v18, %v1328_v61 }
 0x242   : > { %v1285_v54 = vsel %vm560_vm4, %v1281_v43, %v3308_v60  ;;  %v1222_v2 = vsel %vm462_vm3, %v1217_v47, %v1221_v34 }
 0x243   : > { %v3314_v57 = vpack.c.b16 %v1193_v13, %v1192_v3  ;;  %1307 = vrot.lane.b32.xlu2 %v1285_v54, %s2807_s8  ;;  %1250 = vrot.lane.b32.xlu0 %v1222_v2, %s2806_s7  ;;  %v1131_v5 = vadd.f32 %v3186_v53, %v1088_v49  ;;  %v1334_v36 = vsel %vm616_vm5, %v1330_v11, %v1333_v20 }
 0x244   : > { %v1225_v3 = vor.u32 %v3285_v9, %v1221_v34 }
 0x245   : > { %v1422_v8 = vrot.slane %v3314_v57, 4  ;;  %v1363_v38 = vrot.slane %v3314_v57, 3  ;;  %v3329_v7 = vshll.u32 %v3314_v57, 16  ;;  %v3332_v63 = vshrl.u32 %v3314_v57, 16 }
 0x246   : > { %v1155_v33 = vmax.f32 %v1131_v5, 0.0  ;;  %v1263_v26 = vrot.slane %v3314_v57, 1  ;;  %v1052_v5 = vadd.f32 %v3253_v23, %v3262_v46 }
 0x247   : > { %v1423_v53 = vsel %vm732_vm9, %v1421_v62, %v1422_v8  ;;  %v1364_v16 = vsel %vm329_vm0, %v1362_v0, %v1363_v38  ;;  %v1387_v44 = vrot.slane %v3329_v7, 4  ;;  %v1386_v41 = vrot.slane %v3332_v63, 3 }
 0x248   : > { %2563 = vmatmul.msk.bf16.vlgmr.msra.gmra.mxu1 %vm746_vm8, %v1423_v53  ;;  %1373 = vrot.lane.b32.xlu1 %v1364_v16, %s2808_s9  ;;  %v1089_v19 = vpop.f32.mrf.mxu2  ;;  %v1286_v15 = vrot.slane %v3332_v63, 5  ;;  %v1287_v52 = vrot.slane %v3329_v7, 6  ;;  %v1168_v22 = vpack.c.bf16 %v1155_v33, %v1155_v33  ;;  %v1229_v42 = vrot.slane %v3329_v7, 1 }
 0x249   : > { %v1090_v48 = vadd.f32 %v1089_v19, %v1047_v56  ;;  %v1388_v51 = vor.u32 %v1387_v44, %v1386_v41  ;;  %v1264_v43 = vsel %vm532_vm6, %v1261_v50, %v1263_v26  ;;  %v1335_v18 = vrot.slane %v3332_v63, 6 }
 0x24a   : > { %v1288_v13 = vor.u32 %v1287_v52, %v1286_v15  ;;  %v1194_v49 = vunpack.c.l.b16 %v1168_v22  ;;  %v1230_v61 = vsel %vm462_vm3, %v1225_v3, %v1229_v42 }
 0x24b   : > { %v1133_v59 = vadd.f32 %v3198_v10, %v1090_v48  ;;  %1351 = vrot.lane.b32.xlu0 %v1334_v36, %s2806_s7  ;;  %v1389_v39 = vsel %vm459_vm7, %v1385_v55, %v1388_v51  ;;  %v1050_v10 = vadd.f32 %v3251_v24, %v3262_v46  ;;  %v1336_v24 = vrot.slane %v3329_v7, 7  ;;  %v2707_v55 = vld [vmem:[%s3876_s2 + $0xb0] sm:$0xff] }
 0x24c   : > { %1411 = vrot.lane.b32.xlu2 %v1389_v39, %s2807_s8  ;;  %v1289_v50 = vsel %vm560_vm4, %v3308_v60, %v1288_v13 }
 0x24d   : > { %v1156_v27 = vmax.f32 %v1133_v59, 0.0  ;;  %v3381_v1 = vor.u32 %v1336_v24, %v1335_v18  ;;  %v1233_v59 = vor.u32 %v3332_v63, %v1229_v42 }
 0x24f   : > { %v1169_v25 = vpack.c.bf16 %v1156_v27, %v1156_v27  ;;  %v1338_v53 = vsel %vm616_vm5, %v1333_v20, %v3381_v1  ;;  %v2708_v20 = vld [vmem:[%s3876_s2 + $0xb8] sm:$0xff] }
 0x250   : > { %1271 = vrot.lane.b32.xlu1 %v1264_v43, %s2808_s9  ;;  %v1092_v47 = vpop.f32.mrf.mxu2  ;;  %1670 = vmatpush.bf16.msrb.mxu3 %v2708_v20 }
 0x251   : > { %v1195_v54 = vunpack.c.l.b16 %v1169_v25  ;;  %v1093_v2 = vadd.f32 %v1092_v47, %v1050_v10 }
 0x253   : > { %v3369_v58 = vpack.c.b16 %v1195_v54, %v1194_v49  ;;  %1252 = vrot.lane.b32.xlu0 %v1230_v61, %s2806_s7  ;;  %v1136_v62 = vadd.f32 %v3203_v14, %v1093_v2 }
 0x254   : > { %1309 = vrot.lane.b32.xlu2 %v1289_v50, %s2807_s8  ;;  %1671 = vmatpush.bf16.msrb.mxu3 %v2707_v55  ;;  %v2706_v50 = vld [vmem:[%s3876_s2 + $0xa8] sm:$0xff] }
 0x255   : > { %v1424_v9 = vrot.slane %v3369_v58, 4  ;;  %v1365_v34 = vrot.slane %v3369_v58, 3  ;;  %v3379_v0 = vshll.u32 %v3369_v58, 16  ;;  %v3384_v4 = vshrl.u32 %v3369_v58, 16 }
 0x256   : > { %v1157_v35 = vmax.f32 %v1136_v62, 0.0 }
 0x257   : > { %v1425_v60 = vsel %vm732_vm9, %v1422_v8, %v1424_v9  ;;  %v1366_v14 = vsel %vm329_vm0, %v1363_v38, %v1365_v34  ;;  %v1391_v7 = vrot.slane %v3379_v0, 4  ;;  %v1390_v32 = vrot.slane %v3384_v4, 3 }
 0x258   : > { %2564 = vmatmul.msk.bf16.gmra.mxu1 %vm746_vm8, %v1425_v60  ;;  %1375 = vrot.lane.b32.xlu1 %v1366_v14, %s2808_s9  ;;  %v1094_v11 = vpop.f32.mrf.mxu2  ;;  %v1265_v8 = vrot.slane %v3369_v58, 1  ;;  %v1290_v44 = vrot.slane %v3384_v4, 5  ;;  %v1291_v19 = vrot.slane %v3379_v0, 6  ;;  %v1170_v41 = vpack.c.bf16 %v1157_v35, %v1157_v35 }
 0x259   : > { %v1095_v56 = vadd.f32 %v1094_v11, %v1052_v5  ;;  %v1392_v16 = vor.u32 %v1391_v7, %v1390_v32  ;;  %v1237_v48 = vrot.slane %v3379_v0, 1  ;;  %v1339_v27 = vrot.slane %v3384_v4, 6  ;;  %1672 = vmatpush.bf16.msrb.mxu3 %v2706_v50 }
 0x25a   : > { %v1266_v36 = vsel %vm532_vm6, %v1263_v26, %v1265_v8  ;;  %v3420_v39 = vor.u32 %v1291_v19, %v1290_v44  ;;  %v1196_v15 = vunpack.c.l.b16 %v1170_v41  ;;  %v1340_v10 = vrot.slane %v3379_v0, 7 }
 0x25b   : > { %v1138_v23 = vadd.f32 %v3211_v29, %v1095_v56  ;;  %1353 = vrot.lane.b32.xlu0 %v1338_v53, %s2806_s7  ;;  %v1393_v38 = vsel %vm459_vm7, %v1388_v51, %v1392_v16  ;;  %v2715_v29 = vld [vmem:[%s3876_s2 + $0xf0] sm:$0xff]  ;;  %v1238_v22 = vsel %vm462_vm3, %v1233_v59, %v1237_v48  ;;  %v1060_v53 = vadd.f32 %v3259_v12, %v3262_v46 }
 0x25c   : > { %1413 = vrot.lane.b32.xlu2 %v1393_v38, %s2807_s8  ;;  %1705 = vmatpush.bf16.msrb.mxu0 %v2715_v29  ;;  %v1293_v63 = vsel %vm560_vm4, %v1288_v13, %v3420_v39  ;;  %v3442_v49 = vor.u32 %v1340_v10, %v1339_v27  ;;  %v1057_v13 = vadd.f32 %v3257_v31, %v3262_v46 }
 0x25d   : > { %v1158_v33 = vmax.f32 %v1138_v23, 0.0  ;;  %v1241_v44 = vor.u32 %v3384_v4, %v1237_v48 }
 0x25e   : > { %v1342_v31 = vsel %vm616_vm5, %v3381_v1, %v3442_v49  ;;  %v2713_v1 = vld [vmem:[%s3876_s2 + $0xe0] sm:$0xff] }
 0x25f   : > { %v1171_v17 = vpack.c.bf16 %v1158_v33, %v1158_v33 }
 0x260   : > { %1273 = vrot.lane.b32.xlu1 %v1266_v36, %s2808_s9  ;;  %v1097_v51 = vpop.f32.mrf.mxu2  ;;  %1706 = vmatpush.bf16.msrb.mxu0 %v2714_v28 }
 0x261   : > { %v1197_v52 = vunpack.c.l.b16 %v1171_v17  ;;  %v1098_v26 = vadd.f32 %v1097_v51, %v1055_v21 }
 0x263   : > { %v3430_v25 = vpack.c.b16 %v1197_v52, %v1196_v15  ;;  %1254 = vrot.lane.b32.xlu0 %v1238_v22, %s2806_s7  ;;  %v1141_v42 = vadd.f32 %v3218_v37, %v1098_v26 }
 0x264   : > { %1311 = vrot.lane.b32.xlu2 %v1293_v63, %s2807_s8  ;;  %1707 = vmatpush.bf16.msrb.mxu0 %v2713_v1 }
 0x265   : > { %v1426_v43 = vrot.slane %v3430_v25, 4  ;;  %v1367_v47 = vrot.slane %v3430_v25, 3  ;;  %v3440_v3 = vshll.u32 %v3430_v25, 16  ;;  %v3445_v54 = vshrl.u32 %v3430_v25, 16 }
 0x266   : > { %v1159_v62 = vmax.f32 %v1141_v42, 0.0  ;;  %v1267_v60 = vrot.slane %v3430_v25, 1 }
 0x267   : > { %v1427_v2 = vsel %vm732_vm9, %v1424_v9, %v1426_v43  ;;  %v1368_v37 = vsel %vm329_vm0, %v1365_v34, %v1367_v47  ;;  %v1395_v61 = vrot.slane %v3440_v3, 4  ;;  %v1394_v24 = vrot.slane %v3445_v54, 3 }
 0x268   : > { %2565 = vmatmul.msk.bf16.gmra.mxu1 %vm746_vm8, %v1427_v2  ;;  %1377 = vrot.lane.b32.xlu1 %v1368_v37, %s2808_s9  ;;  %v1099_v18 = vpop.f32.mrf.mxu2  ;;  %v1294_v7 = vrot.slane %v3445_v54, 5  ;;  %v1295_v11 = vrot.slane %v3440_v3, 6  ;;  %v1172_v32 = vpack.c.bf16 %v1159_v62, %v1159_v62  ;;  %v1245_v56 = vrot.slane %v3440_v3, 1 }
 0x269   : > { %v1100_v5 = vadd.f32 %v1099_v18, %v1057_v13  ;;  %v1396_v9 = vor.u32 %v1395_v61, %v1394_v24  ;;  %v1268_v23 = vsel %vm532_vm6, %v1265_v8, %v1267_v60  ;;  %v1343_v20 = vrot.slane %v3445_v54, 6  ;;  %v2712_v13 = vld [vmem:[%s3876_s2 + $0xd8] sm:$0xff] }
 0x26a   : > { %v1296_v19 = vor.u32 %v1295_v11, %v1294_v7  ;;  %v1198_v41 = vunpack.c.l.b16 %v1172_v32  ;;  %v1246_v46 = vsel %vm462_vm3, %v1241_v44, %v1245_v56  ;;  %v1344_v29 = vrot.slane %v3440_v3, 7  ;;  %v2704_v3 = vld [vmem:[%s3876_s2 + $0x98] sm:$0xff]  ;;  %1708 = vmatpush.bf16.msrb.mxu0 %v2712_v13  ;;  %v2703_v32 = vld [vmem:[%s3876_s2 + $0x90] sm:$0xff] }
 0x26b   : > { %v1143_v34 = vadd.f32 %v3226_v40, %v1100_v5  ;;  %1355 = vrot.lane.b32.xlu0 %v1342_v31, %s2806_s7  ;;  %v1397_v14 = vsel %vm459_vm7, %v1392_v16, %v1396_v9  ;;  %v2705_v40 = vld [vmem:[%s3876_s2 + $0xa0] sm:$0xff]  ;;  %v1249_v31 = vor.u32 %v3445_v54, %v1245_v56 }
 0x26c   : > { %1415 = vrot.lane.b32.xlu2 %v1397_v14, %s2807_s8  ;;  %1673 = vmatpush.bf16.msrb.mxu3 %v2705_v40  ;;  %v1297_v0 = vsel %vm560_vm4, %v3420_v39, %v1296_v19  ;;  %v1345_v55 = vor.u32 %v1344_v29, %v1343_v20 }
 0x26d   : > { %v1160_v35 = vmax.f32 %v1143_v34, 0.0 }
 0x26e   : > { %v1346_v22 = vsel %vm616_vm5, %v3442_v49, %v1345_v55 }
 0x26f   : > { %v1173_v16 = vpack.c.bf16 %v1160_v35, %v1160_v35  ;;  %v2711_v35 = vld [vmem:[%s3876_s2 + $0xd0] sm:$0xff] }
 0x270   : > { %1275 = vrot.lane.b32.xlu1 %v1268_v23, %s2808_s9  ;;  %v1102_v38 = vpop.f32.mrf.mxu2  ;;  %1674 = vmatpush.bf16.msrb.mxu3 %v2704_v3 }
 0x271   : > { %v1199_v33 = vunpack.c.l.b16 %v1173_v16  ;;  %v1103_v12 = vadd.f32 %v1102_v38, %v1060_v53  ;;  %1709 = vmatpush.bf16.msrb.mxu0 %v2711_v35 }
 0x273   : > { %v3489_v8 = vpack.c.b16 %v1199_v33, %v1198_v41  ;;  %v1146_v21 = vadd.f32 %v3232_v45, %v1103_v12  ;;  %1256 = vrot.lane.b32.xlu0 %v1246_v46, %s2806_s7  ;;  %v1318_v33 = vrot.slane %v3280_v6, 6 }
 0x274   : > { %1313 = vrot.lane.b32.xlu2 %v1297_v0, %s2807_s8  ;;  %1675 = vmatpush.bf16.msrb.mxu3 %v2703_v32 }
 0x275   : > { %v1161_v4 = vmax.f32 %v1146_v21, 0.0  ;;  %v1428_v48 = vrot.slane %v3489_v8, 4  ;;  %v1369_v17 = vrot.slane %v3489_v8, 3  ;;  %v1299_v36 = vshrl.u32 %v3489_v8, 16 }
 0x276   : > { %v1302_v51 = vshll.u32 %v3489_v8, 16 }
 0x277   : > { %v1174_v59 = vpack.c.bf16 %v1161_v4, %v1161_v4  ;;  %v1429_v45 = vsel %vm732_vm9, %v1426_v43, %v1428_v48  ;;  %v1370_v28 = vsel %vm329_vm0, %v1367_v47, %v1369_v17  ;;  %v1398_v15 = vrot.slane %v1299_v36, 3 }
 0x278   : > { %2566 = vmatmul.msk.bf16.gmra.mxu1 %vm746_vm8, %v1429_v45  ;;  %1379 = vrot.lane.b32.xlu1 %v1370_v28, %s2808_s9  ;;  %v1104_v39 = vpop.f32.mrf.mxu2  ;;  %v1399_v52 = vrot.slane %v1302_v51, 4  ;;  %v1301_v63 = vrot.slane %v1299_v36, 5  ;;  %v1304_v42 = vrot.slane %v1302_v51, 6  ;;  %v1348_v34 = vrot.slane %v1302_v51, 7 }
 0x279   : > { %v1200_v26 = vunpack.c.l.b16 %v1174_v59 }
 0x27a   : > { %v1400_v27 = vor.u32 %v1399_v52, %v1398_v15  ;;  %v1305_v18 = vor.u32 %v1304_v42, %v1301_v63  ;;  %v1322_v42 = vrot.slane %v3369_v58, 6 }
 0x27b   : > { %v1207_v10 = vpack.c.b16 %v1200_v26, %v1200_v26  ;;  %1357 = vrot.lane.b32.xlu0 %v1346_v22, %s2806_s7 }
 0x27c   : > { %v1401_v43 = vsel %vm459_vm7, %v1396_v9, %v1400_v27  ;;  %v1347_v9 = vrot.slane %v1299_v36, 6  ;;  %v1306_v7 = vsel %vm560_vm4, %v1296_v19, %v1305_v18  ;;  %v1317_v19 = vrot.slane %v3293_v30, 6 }
 0x27d   : > { %v1210_v47 = vsel %vm1209_vm14, %v1207_v10, 0  ;;  %1417 = vrot.lane.b32.xlu2 %v1401_v43, %s2807_s8 }
 0x27e   : > { %v1430_v49 = vrot.slane %v1210_v47, 4  ;;  %v1371_v2 = vrot.slane %v1210_v47, 3  ;;  %v1403_v37 = vshrl.u32 %v1210_v47, 16  ;;  %v1406_v61 = vshll.u32 %v1210_v47, 16 }
 0x27f   : > { %v1319_v12 = vsel %vm602_vm13, %v1317_v19, %v1318_v33 }
 0x280   : > { %1277 = vrot.lane.b32.xlu1 %v1267_v60, %s2808_s9  ;;  %v1431_v24 = vsel %vm732_vm9, %v1428_v48, %v1430_v49  ;;  %v1372_v50 = vsel %vm329_vm0, %v1369_v17, %v1371_v2  ;;  %v1405_v62 = vrot.slane %v1403_v37, 3  ;;  %v1408_v5 = vrot.slane %v1406_v61, 4 }
 0x281   : > { %v1349_v60 = vor.u32 %v1348_v34, %v1347_v9 }
 0x282   : > { %v1409_v14 = vor.u32 %v1408_v5, %v1405_v62  ;;  %v1324_v62 = vrot.slane %v3430_v25, 6 }
 0x283   : > { %1258 = vrot.lane.b32.xlu0 %v1249_v31, %s2806_s7  ;;  %v1350_v54 = vsel %vm616_vm5, %v1345_v55, %v1349_v60  ;;  %v1320_v55 = vrot.slane %v3314_v57, 6 }
 0x284   : > { %v1410_v11 = vsel %vm459_vm7, %v1400_v27, %v1409_v14  ;;  %v1325_v9 = vsel %vm602_vm13, %v1322_v42, %v1324_v62 }
 0x285   : > { %1315 = vrot.lane.b32.xlu2 %v1306_v7, %s2807_s8  ;;  %v1321_v45 = vsel %vm602_vm13, %v1318_v33, %v1320_v55  ;;  %v1323_v47 = vsel %vm602_vm13, %v1320_v55, %v1322_v42  ;;  %v3589_v33 = vld [vmem:[%s3877_s3] sm:$0xf] }
 0x288   : > { %2567 = vmatmul.msk.bf16.gmra.mxu1 %vm746_vm8, %v1431_v24  ;;  %1381 = vrot.lane.b32.xlu1 %v1372_v50, %s2808_s9 }
 0x28b   : > { %1359 = vrot.lane.b32.xlu0 %v1350_v54, %s2806_s7 }
 0x28d   : > { %1419 = vrot.lane.b32.xlu2 %v1410_v11, %s2807_s8 }
 0x29d   : > { %v1308_v1 = vpop.permute.xlu2 %1307 }
 0x2a6   : > { %v1412_v40 = vpop.permute.xlu2 %1411 }
 0x2ae   : > { %v1310_v44 = vpop.permute.xlu2 %1309 }
 0x2b1   : > { %v1270_v56 = vpop.permute.xlu1 %1269 }
 0x2b5   : > { %v1251_v53 = vpop.permute.xlu0 %1250 }
 0x2b6   : > { %v1433_v16 = vsel %vm746_vm8, %v3293_v30, %v1251_v53  ;;  %v1414_v4 = vpop.permute.xlu2 %1413 }
 0x2b7   : > { %v1443_v23 = vsel %vm761_vm11, %v1433_v16, %v1270_v56 }
 0x2b8   : > { %v1453_v38 = vsel %vm776_vm12, %v1443_v23, %v1308_v1 }
 0x2b9   : > { %1676 = vmatmul.bf16.vlgmr.msrb.gmra.mxu3 %v1453_v38 }
 0x2ba   : > { %v1374_v41 = vpop.permute.xlu1 %1373 }
 0x2bd   : > { %v1352_v46 = vpop.permute.xlu0 %1351 }
 0x2be   : > { %v1469_v20 = vsel %vm746_vm8, %v1319_v12, %v1352_v46  ;;  %v1312_v59 = vpop.permute.xlu2 %1311 }
 0x2bf   : > { %v1483_v29 = vsel %vm761_vm11, %v1469_v20, %v1374_v41 }
 0x2c0   : > { %v1493_v21 = vsel %vm776_vm12, %v1483_v29, %v1412_v40  ;;  %v1326_v40 = vrot.slane %v3489_v8, 6  ;;  %v3592_v8 = vperm.slane %v3589_v33, 2 }
 0x2c1   : > { %1710 = vmatmul.bf16.vlgmr.msrb.gmra.mxu0 %v1493_v21 }
 0x2c2   : > { %v1272_v0 = vpop.permute.xlu1 %1271  ;;  %v1327_v56 = vsel %vm602_vm13, %v1324_v62, %v1326_v40 }
 0x2c5   : > { %v1253_v48 = vpop.permute.xlu0 %1252 }
 0x2c6   : > { %v1435_v17 = vsel %vm746_vm8, %v3280_v6, %v1253_v48  ;;  %v1416_v27 = vpop.permute.xlu2 %1415 }
 0x2c7   : > { %v1445_v30 = vsel %vm761_vm11, %v1435_v17, %v1272_v0 }
 0x2c8   : > { %v1456_v36 = vsel %vm776_vm12, %v1445_v30, %v1310_v44 }
 0x2c9   : > { %1681 = vmatmul.bf16.gmra.mxu3 %v1456_v36 }
 0x2ca   : > { %v1376_v51 = vpop.permute.xlu1 %1375 }
 0x2cd   : > { %v1354_v28 = vpop.permute.xlu0 %1353 }
 0x2ce   : > { %v1472_v15 = vsel %vm746_vm8, %v1321_v45, %v1354_v28  ;;  %v1314_v37 = vpop.permute.xlu2 %1313 }
 0x2cf   : > { %v1485_v39 = vsel %vm761_vm11, %v1472_v15, %v1376_v51 }
 0x2d0   : > { %v1496_v52 = vsel %vm776_vm12, %v1485_v39, %v1414_v4 }
 0x2d1   : > { %1715 = vmatmul.bf16.gmra.mxu0 %v1496_v52 }
 0x2d2   : > { %v1274_v6 = vpop.permute.xlu1 %1273 }
 0x2d5   : > { %v1255_v26 = vpop.permute.xlu0 %1254 }
 0x2d6   : > { %v1437_v22 = vsel %vm746_vm8, %v3314_v57, %v1255_v26 }
 0x2d7   : > { %v1447_v10 = vsel %vm761_vm11, %v1437_v22, %v1274_v6  ;;  %v1418_v31 = vpop.permute.xlu2 %1417 }
 0x2d8   : > { %v1459_v63 = vsel %vm776_vm12, %v1447_v10, %v1312_v59 }
 0x2d9   : > { %1686 = vmatmul.bf16.gmra.mxu3 %v1459_v63 }
 0x2da   : > { %v1378_v43 = vpop.permute.xlu1 %1377 }
 0x2dd   : > { %v1356_v3 = vpop.permute.xlu0 %1355 }
 0x2de   : > { %v1475_v13 = vsel %vm746_vm8, %v1323_v47, %v1356_v3 }
 0x2df   : > { %v1487_v49 = vsel %vm761_vm11, %v1475_v13, %v1378_v43  ;;  %v1316_v60 = vpop.permute.xlu2 %1315 }
 0x2e0   : > { %v1499_v2 = vsel %vm776_vm12, %v1487_v49, %v1416_v27 }
 0x2e1   : > { %1720 = vmatmul.bf16.gmra.mxu0 %v1499_v2 }
 0x2e2   : > { %v1276_v57 = vpop.permute.xlu1 %1275 }
 0x2e5   : > { %v1257_v61 = vpop.permute.xlu0 %1256 }
 0x2e6   : > { %v1439_v18 = vsel %vm746_vm8, %v3369_v58, %v1257_v61 }
 0x2e7   : > { %v1449_v24 = vsel %vm761_vm11, %v1439_v18, %v1276_v57  ;;  %v1420_v38 = vpop.permute.xlu2 %1419 }
 0x2e8   : > { %v1462_v50 = vsel %vm776_vm12, %v1449_v24, %v1314_v37 }
 0x2e9   : > { %1691 = vmatmul.bf16.gmra.mxu3 %v1462_v50  ;;  %v2728_v50 = vld [vmem:[%s3876_s2 + $0x158] sm:$0xff] }
 0x2ea   : > { %v1380_v5 = vpop.permute.xlu1 %1379  ;;  %2769 = vmatpush.bf16.msrb.mxu2 %v2728_v50  ;;  %2205 = vmatpush.bf16.msra.mxu0 %v2728_v50 }
 0x2ed   : > { %v1358_v34 = vpop.permute.xlu0 %1357 }
 0x2ee   : > { %v1478_v14 = vsel %vm746_vm8, %v1325_v9, %v1358_v34 }
 0x2ef   : > { %v1489_v7 = vsel %vm761_vm11, %v1478_v14, %v1380_v5 }
 0x2f0   : > { %v1502_v11 = vsel %vm776_vm12, %v1489_v7, %v1418_v31 }
 0x2f1   : > { %1725 = vmatmul.bf16.gmra.mxu0 %v1502_v11 }
 0x2f2   : > { %v1278_v58 = vpop.permute.xlu1 %1277 }
 0x2f5   : > { %v1259_v32 = vpop.permute.xlu0 %1258 }
 0x2f6   : > { %v1441_v54 = vsel %vm746_vm8, %v3430_v25, %v1259_v32  ;;  %v1745_v25 = vpop.f32.mrf.mxu1 }
 0x2f7   : > { %v1451_v35 = vsel %vm761_vm11, %v1441_v54, %v1278_v58 }
 0x2f8   : > { %v1465_v1 = vsel %vm776_vm12, %v1451_v35, %v1316_v60 }
 0x2f9   : > { %1696 = vmatmul.bf16.gmra.mxu3 %v1465_v1 }
 0x2fa   : > { %v1382_v16 = vpop.permute.xlu1 %1381 }
 0x2fd   : > { %v1360_v53 = vpop.permute.xlu0 %1359 }
 0x2fe   : > { %v1481_v23 = vsel %vm746_vm8, %v1327_v56, %v1360_v53  ;;  %v3584_v41 = vpop.f32.mrf.mxu1 }
 0x2ff   : > { %v1491_v44 = vsel %vm761_vm11, %v1481_v23, %v1382_v16 }
 0x300   : > { %v1505_v19 = vsel %vm776_vm12, %v1491_v44, %v1420_v38 }
 0x301   : > { %1730 = vmatmul.bf16.gmra.mxu0 %v1505_v19 }
 0x306   : > { %v1750_v0 = vpop.f32.mrf.mxu1 }
 0x30e   : > { %v1752_v17 = vpop.f32.mrf.mxu1 }
 0x316   : > { %v1755_v45 = vpop.f32.mrf.mxu1 }
 0x31e   : > { %v1757_v43 = vpop.f32.mrf.mxu1 }
 0x326   : > { %v1760_v31 = vpop.f32.mrf.mxu1 }
 0x33c   : > { %v1677_v12 = vpop.f32.mrf.mxu3 }
 0x33d   : > { %v1678_v46 = vadd.f32 %v1677_v12, %v3592_v8  ;;  %v1762_v12 = vpop.f32.mrf.mxu1 }
 0x33e   : > { %v1711_v20 = vpop.f32.mrf.mxu0 }
 0x33f   : > { %v1712_v29 = vadd.f32 %v1711_v20, %v1678_v46 }
 0x341   : > { %v3595_v21 = vadd.f32 %v1745_v25, %v1712_v29  ;;  %v2727_v25 = vld [vmem:[%s3876_s2 + $0x150] sm:$0xff] }
 0x342   : > { %2770 = vmatpush.bf16.msrb.mxu2 %v2727_v25  ;;  %2206 = vmatpush.bf16.msra.mxu0 %v2727_v25 }
 0x344   : > { %v1679_v4 = vpop.f32.mrf.mxu3 }
 0x345   : > { %v1680_v1 = vadd.f32 %v1679_v4, %v3592_v8 }
 0x346   : > { %v1713_v48 = vpop.f32.mrf.mxu0 }
 0x347   : > { %v1714_v46 = vadd.f32 %v1713_v48, %v1680_v1 }
 0x34c   : > { %v1682_v30 = vpop.f32.mrf.mxu3 }
 0x34d   : > { %v1683_v55 = vadd.f32 %v1682_v30, %v3592_v8 }
 0x34e   : > { %v1716_v36 = vpop.f32.mrf.mxu0 }
 0x34f   : > { %v1717_v15 = vadd.f32 %v1716_v36, %v1683_v55 }
 0x351   : > { %v1751_v6 = vadd.f32 %v1750_v0, %v1717_v15  ;;  %v1748_v15 = vadd.f32 %v3584_v41, %v1714_v46 }
 0x353   : > { %v1772_v63 = vmax.f32 %v1751_v6, 0.0  ;;  %v2726_v6 = vld [vmem:[%s3876_s2 + $0x148] sm:$0xff]  ;;  %v1771_v41 = vmax.f32 %v1748_v15, 0.0 }
 0x354   : > { %v1684_v51 = vpop.f32.mrf.mxu3  ;;  %2771 = vmatpush.bf16.msrb.mxu2 %v2726_v6  ;;  %2207 = vmatpush.bf16.msra.mxu0 %v2726_v6 }
 0x355   : > { %v1685_v59 = vadd.f32 %v1684_v51, %v3592_v8  ;;  %v1782_v3 = vpack.c.bf16 %v1772_v63, %v1772_v63 }
 0x356   : > { %v1718_v28 = vpop.f32.mrf.mxu0 }
 0x357   : > { %v1719_v39 = vadd.f32 %v1718_v28, %v1685_v59  ;;  %v1802_v61 = vunpack.c.l.b16 %v1782_v3  ;;  %v1770_v3 = vmax.f32 %v3595_v21, 0.0 }
 0x359   : > { %v1753_v52 = vadd.f32 %v1752_v17, %v1719_v39 }
 0x35b   : > { %v1773_v22 = vmax.f32 %v1753_v52, 0.0 }
 0x35c   : > { %v1687_v26 = vpop.f32.mrf.mxu3 }
 0x35d   : > { %v1688_v27 = vadd.f32 %v1687_v26, %v3592_v8  ;;  %v1783_v47 = vpack.c.bf16 %v1773_v22, %v1773_v22 }
 0x35e   : > { %v1721_v10 = vpop.f32.mrf.mxu0 }
 0x35f   : > { %v1722_v42 = vadd.f32 %v1721_v10, %v1688_v27  ;;  %v1803_v2 = vunpack.c.l.b16 %v1783_v47  ;;  %v1765_v47 = vpop.f32.mrf.mxu1 }
 0x361   : > { %v1756_v13 = vadd.f32 %v1755_v45, %v1722_v42  ;;  %v3604_v62 = vpack.c.b16 %v1803_v2, %v1802_v61 }
 0x363   : > { %v1774_v18 = vmax.f32 %v1756_v13, 0.0  ;;  %v3608_v58 = vshll.u32 %v3604_v62, 16  ;;  %v3612_v40 = vshrl.u32 %v3604_v62, 16  ;;  %v1859_v16 = vrot.slane %v3604_v62, 1 }
 0x364   : > { %v1689_v49 = vpop.f32.mrf.mxu3 }
 0x365   : > { %v1690_v37 = vadd.f32 %v1689_v49, %v3592_v8  ;;  %v1784_v9 = vpack.c.bf16 %v1774_v18, %v1774_v18  ;;  %v1829_v53 = vrot.slane %v3608_v58, 1  ;;  %v1876_v29 = vrot.slane %v3612_v40, 5 }
 0x366   : > { %v1723_v57 = vpop.f32.mrf.mxu0  ;;  %v1877_v0 = vrot.slane %v3608_v58, 6  ;;  %v1780_v18 = vpack.c.bf16 %v1770_v3, %v1770_v3 }
 0x367   : > { %v1724_v24 = vadd.f32 %v1723_v57, %v1690_v37  ;;  %v1804_v32 = vunpack.c.l.b16 %v1784_v9  ;;  %v1833_v30 = vor.u32 %v3612_v40, %v1829_v53  ;;  %v1781_v57 = vpack.c.bf16 %v1771_v41, %v1771_v41  ;;  %v1767_v25 = vpop.f32.mrf.mxu1 }
 0x368   : > { %v3644_v39 = vor.u32 %v1877_v0, %v1876_v29  ;;  %v1800_v1 = vunpack.c.l.b16 %v1780_v18 }
 0x369   : > { %v1758_v5 = vadd.f32 %v1757_v43, %v1724_v24  ;;  %v1801_v9 = vunpack.c.l.b16 %v1781_v57 }
 0x36b   : > { %v1775_v34 = vmax.f32 %v1758_v5, 0.0  ;;  %v3675_v46 = vpack.c.b16 %v1801_v9, %v1800_v1 }
 0x36c   : > { %v1692_v14 = vpop.f32.mrf.mxu3 }
 0x36d   : > { %v1785_v7 = vpack.c.bf16 %v1775_v34, %v1775_v34  ;;  %v1693_v11 = vadd.f32 %v1692_v14, %v3592_v8 }
 0x36e   : > { %v1726_v60 = vpop.f32.mrf.mxu0 }
 0x36f   : > { %v1805_v54 = vunpack.c.l.b16 %v1785_v7  ;;  %v1727_v35 = vadd.f32 %v1726_v60, %v1693_v11 }
 0x371   : > { %v3614_v56 = vpack.c.b16 %v1805_v54, %v1804_v32  ;;  %v1761_v23 = vadd.f32 %v1760_v31, %v1727_v35  ;;  %v2725_v35 = vld [vmem:[%s3876_s2 + $0x140] sm:$0xff] }
 0x372   : > { %2772 = vmatpush.bf16.msrb.mxu2 %v2725_v35  ;;  %2208 = vmatpush.bf16.msra.mxu0 %v2725_v35 }
 0x373   : > { %v1861_v38 = vrot.slane %v3614_v56, 1  ;;  %v3620_v44 = vshll.u32 %v3614_v56, 16  ;;  %v3623_v19 = vshrl.u32 %v3614_v56, 16  ;;  %v1776_v59 = vmax.f32 %v1761_v23, 0.0 }
 0x374   : > { %v1694_v20 = vpop.f32.mrf.mxu3  ;;  %v1943_v15 = vrot.slane %v3614_v56, 3 }
 0x375   : > { %v1695_v4 = vadd.f32 %v1694_v20, %v3592_v8  ;;  %v1862_v17 = vsel %vm532_vm6, %v1859_v16, %v1861_v38  ;;  %v1837_v36 = vrot.slane %v3620_v44, 1  ;;  %v1880_v55 = vrot.slane %v3623_v19, 5 }
 0x376   : > { %1867 = vrot.lane.b32.xlu1 %v1862_v17, %s2808_s9  ;;  %v1728_v48 = vpop.f32.mrf.mxu0  ;;  %v1881_v51 = vrot.slane %v3620_v44, 6  ;;  %v1786_v27 = vpack.c.bf16 %v1776_v59, %v1776_v59  ;;  %v1918_v59 = vrot.slane %v3612_v40, 6 }
 0x377   : > { %v1729_v45 = vadd.f32 %v1728_v48, %v1695_v4  ;;  %v1838_v28 = vsel %vm462_vm3, %v1833_v30, %v1837_v36  ;;  %v1841_v7 = vor.u32 %v3623_v19, %v1837_v36  ;;  %v3680_v30 = vshrl.u32 %v3675_v46, 16 }
 0x378   : > { %1852 = vrot.lane.b32.xlu0 %v1838_v28, %s2806_s7  ;;  %v1882_v52 = vor.u32 %v1881_v51, %v1880_v55  ;;  %v1806_v49 = vunpack.c.l.b16 %v1786_v27  ;;  %v3683_v36 = vshll.u32 %v3675_v46, 16 }
 0x379   : > { %v1763_v26 = vadd.f32 %v1762_v12, %v1729_v45  ;;  %v1919_v45 = vrot.slane %v3608_v58, 7 }
 0x37a   : > { %v1883_v22 = vsel %vm560_vm4, %v3644_v39, %v1882_v52  ;;  %v1916_v6 = vrot.slane %v3683_v36, 7 }
 0x37b   : > { %v1777_v10 = vmax.f32 %v1763_v26, 0.0  ;;  %1899 = vrot.lane.b32.xlu2 %v1883_v22, %s2807_s8  ;;  %v1942_v22 = vrot.slane %v3604_v62, 3  ;;  %v1920_v27 = vor.u32 %v1919_v45, %v1918_v59  ;;  %v1873_v59 = vrot.slane %v3680_v30, 5 }
 0x37c   : > { %v1697_v63 = vpop.f32.mrf.mxu3  ;;  %v1874_v45 = vrot.slane %v3683_v36, 6 }
 0x37d   : > { %v1787_v42 = vpack.c.bf16 %v1777_v10, %v1777_v10  ;;  %v1698_v43 = vadd.f32 %v1697_v63, %v3592_v8  ;;  %v2724_v10 = vld [vmem:[%s3876_s2 + $0x138] sm:$0xff] }
 0x37e   : > { %v1731_v13 = vpop.f32.mrf.mxu0  ;;  %2773 = vmatpush.bf16.msrb.mxu2 %v2724_v10  ;;  %2209 = vmatpush.bf16.msra.mxu0 %v2724_v10  ;;  %v2732_v10 = vld [vmem:[%s3876_s2 + $0x178] sm:$0xff] }
 0x37f   : > { %v1807_v2 = vunpack.c.l.b16 %v1787_v42  ;;  %v1732_v37 = vadd.f32 %v1731_v13, %v1698_v43  ;;  %v1944_v42 = vsel %vm329_vm0, %v1942_v22, %v1943_v15 }
 0x381   : > { %v3654_v61 = vpack.c.b16 %v1807_v2, %v1806_v49  ;;  %v1766_v24 = vadd.f32 %v1765_v47, %v1732_v37  ;;  %v1922_v49 = vrot.slane %v3623_v19, 6  ;;  %v1923_v2 = vrot.slane %v3620_v44, 7 }
 0x383   : > { %v1863_v50 = vrot.slane %v3654_v61, 1  ;;  %v3658_v5 = vshll.u32 %v3654_v61, 16  ;;  %v3661_v31 = vshrl.u32 %v3654_v61, 16  ;;  %v1778_v23 = vmax.f32 %v1766_v24, 0.0 }
 0x384   : > { %v1699_v34 = vpop.f32.mrf.mxu3  ;;  %v1945_v57 = vrot.slane %v3654_v61, 3  ;;  %v1960_v24 = vrot.slane %v3623_v19, 3  ;;  %v1924_v9 = vor.u32 %v1923_v2, %v1922_v49  ;;  %v2729_v2 = vld [vmem:[%s3876_s2 + $0x160] sm:$0xff] }
 0x385   : > { %v1700_v21 = vadd.f32 %v1699_v34, %v3592_v8  ;;  %v1864_v14 = vsel %vm532_vm6, %v1861_v38, %v1863_v50  ;;  %v1845_v11 = vrot.slane %v3658_v5, 1  ;;  %v1884_v32 = vrot.slane %v3661_v31, 5 }
 0x386   : > { %1869 = vrot.lane.b32.xlu1 %v1864_v14, %s2808_s9  ;;  %v1733_v60 = vpop.f32.mrf.mxu0  ;;  %v1885_v54 = vrot.slane %v3658_v5, 6  ;;  %v1788_v0 = vpack.c.bf16 %v1778_v23, %v1778_v23  ;;  %v1957_v34 = vrot.slane %v3612_v40, 3  ;;  %v1946_v14 = vsel %vm329_vm0, %v1943_v15, %v1945_v57  ;;  %v2723_v23 = vld [vmem:[%s3876_s2 + $0x130] sm:$0xff] }
 0x387   : > { %v1734_v8 = vadd.f32 %v1733_v60, %v1700_v21  ;;  %v1846_v38 = vsel %vm462_vm3, %v1841_v7, %v1845_v11  ;;  %v1849_v48 = vor.u32 %v3661_v31, %v1845_v11  ;;  %v1958_v21 = vrot.slane %v3608_v58, 4  ;;  %2774 = vmatpush.bf16.msrb.mxu2 %v2723_v23  ;;  %2210 = vmatpush.bf16.msra.mxu0 %v2723_v23  ;;  %v2735_v58 = vld [vmem:[%s3876_s2 + $0x190] sm:$0xff] }
 0x388   : > { %1854 = vrot.lane.b32.xlu0 %v1846_v38, %s2806_s7  ;;  %v1886_v12 = vor.u32 %v1885_v54, %v1884_v32  ;;  %v1808_v55 = vunpack.c.l.b16 %v1788_v0  ;;  %v1925_v11 = vsel %vm616_vm5, %v1920_v27, %v1924_v9  ;;  %v1926_v60 = vrot.slane %v3661_v31, 6 }
 0x389   : > { %v1768_v20 = vadd.f32 %v1767_v25, %v1734_v8  ;;  %v1927_v19 = vrot.slane %v3658_v5, 7  ;;  %v1964_v54 = vrot.slane %v3661_v31, 3  ;;  %v1965_v35 = vrot.slane %v3658_v5, 4  ;;  %v2736_v8 = vld [vmem:[%s3876_s2 + $0x198] sm:$0xff]  ;;  %v2722_v31 = vld [vmem:[%s3876_s2 + $0x128] sm:$0xff] }
 0x38a   : > { %v1887_v29 = vsel %vm560_vm4, %v1882_v52, %v1886_v12  ;;  %v1915_v52 = vrot.slane %v3680_v30, 6  ;;  %2233 = vmatpush.bf16.msra.mxu3 %v2736_v8 }
 0x38b   : > { %v1779_v4 = vmax.f32 %v1768_v20, 0.0  ;;  %1901 = vrot.lane.b32.xlu2 %v1887_v29, %s2807_s8  ;;  %v1928_v1 = vor.u32 %v1927_v19, %v1926_v60  ;;  %v1966_v5 = vor.u32 %v1965_v35, %v1964_v54  ;;  %2775 = vmatpush.bf16.msrb.mxu2 %v2722_v31  ;;  %v1906_v19 = vrot.slane %v3675_v46, 6 }
 0x38c   : > { %v1917_v43 = vor.u32 %v1916_v6, %v1915_v52  ;;  %2211 = vmatpush.bf16.msra.mxu0 %v2722_v31  ;;  %v1875_v52 = vor.u32 %v1874_v45, %v1873_v59  ;;  %v2734_v6 = vld [vmem:[%s3876_s2 + $0x188] sm:$0xff]  ;;  %v1909_v31 = vrot.slane %v3614_v56, 6  ;;  %v1911_v45 = vrot.slane %v3654_v61, 6 }
 0x38d   : > { %v1789_v17 = vpack.c.bf16 %v1779_v4, %v1779_v4  ;;  %v1929_v25 = vsel %vm616_vm5, %v1924_v9, %v1928_v1  ;;  %v1858_v4 = vrot.slane %v3675_v46, 1 }
 0x38e   : > { %1871 = vrot.lane.b32.xlu1 %v1863_v50, %s2808_s9  ;;  %v1921_v13 = vsel %vm616_vm5, %v1917_v43, %v1920_v27  ;;  %v1961_v50 = vrot.slane %v3620_v44, 4  ;;  %v1959_v44 = vor.u32 %v1958_v21, %v1957_v34  ;;  %2234 = vmatpush.bf16.msra.mxu3 %v2735_v58  ;;  %v2738_v27 = vld [vmem:[%s3876_s2 + $0x1a8] sm:$0xff]  ;;  %v1983_v58 = vrot.slane %v3654_v61, 4 }
 0x38f   : > { %v1809_v51 = vunpack.c.l.b16 %v1789_v17  ;;  %v1860_v17 = vsel %vm532_vm6, %v1858_v4, %v1859_v16 }
 0x390   : > { %1856 = vrot.lane.b32.xlu0 %v1849_v48, %s2806_s7  ;;  %v1962_v7 = vor.u32 %v1961_v50, %v1960_v24 }
 0x391   : > { %v1814_v28 = vpack.c.b16 %v1809_v51, %v1808_v55 }
 0x392   : > { %v1963_v40 = vsel %vm459_vm7, %v1959_v44, %v1962_v7  ;;  %v1967_v20 = vsel %vm459_vm7, %v1962_v7, %v1966_v5  ;;  %2235 = vmatpush.bf16.msra.mxu3 %v2734_v6 }
 0x393   : > { %v3694_v26 = vsel %vm1817_vm1, %v1814_v28, 0 }
 0x394   : > { %v3701_v41 = vshrl.u32 %v3694_v26, 16  ;;  %v3704_v63 = vshll.u32 %v3694_v26, 16  ;;  %v1947_v32 = vrot.slane %v3694_v26, 3 }
 0x396   : > { %1949 = vrot.lane.b32.xlu1 %v1944_v42, %s2808_s9  ;;  %v1891_v47 = vrot.slane %v3701_v41, 5  ;;  %v1894_v3 = vrot.slane %v3704_v63, 6  ;;  %v1948_v38 = vsel %vm329_vm0, %v1945_v57, %v1947_v32  ;;  %v1968_v29 = vrot.slane %v3701_v41, 3  ;;  %v2730_v42 = vld [vmem:[%s3876_s2 + $0x168] sm:$0xff] }
 0x397   : > { %v1969_v0 = vrot.slane %v3704_v63, 4  ;;  %v1930_v15 = vrot.slane %v3701_v41, 6  ;;  %v1931_v16 = vrot.slane %v3704_v63, 7  ;;  %v2731_v41 = vld [vmem:[%s3876_s2 + $0x170] sm:$0xff]  ;;  %v2737_v63 = vld [vmem:[%s3876_s2 + $0x1a0] sm:$0xff]  ;;  %vm2295_vm0 = vcmask 260096  }
 0x398   : > { %1934 = vrot.lane.b32.xlu0 %v1921_v13, %s2806_s7  ;;  %v1895_v37 = vor.u32 %v1894_v3, %v1891_v47 }
 0x399   : > { %v1970_v55 = vor.u32 %v1969_v0, %v1968_v29  ;;  %v1981_v29 = vrot.slane %v3614_v56, 4 }
 0x39a   : > { %v1896_v18 = vsel %vm560_vm4, %v1886_v12, %v1895_v37  ;;  %v1824_v12 = vrot.slane %v3683_v36, 1  ;;  %v1879_v36 = vsel %vm560_vm4, %v1875_v52, %v3644_v39  ;;  %v2733_v39 = vld [vmem:[%s3876_s2 + $0x180] sm:$0xff] }
 0x39b   : > { %1903 = vrot.lane.b32.xlu2 %v1896_v18, %s2807_s8  ;;  %v1971_v28 = vsel %vm459_vm7, %v1966_v5, %v1970_v55  ;;  %2236 = vmatpush.bf16.msra.mxu3 %v2733_v39  ;;  %v1984_v39 = vsel %vm732_vm9, %v1981_v29, %v1983_v58 }
 0x39c   : > { %v1825_v48 = vor.u32 %v1824_v12, %v3680_v30  ;;  %v1932_v30 = vor.u32 %v1931_v16, %v1930_v15  ;;  %v1912_v15 = vsel %vm602_vm13, %v1909_v31, %v1911_v45 }
 0x39e   : > { %1951 = vrot.lane.b32.xlu1 %v1946_v14, %s2808_s9  ;;  %v1830_v51 = vsel %vm462_vm3, %v1825_v48, %v1829_v53  ;;  %v2721_v53 = vld [vmem:[%s3876_s2 + $0x120] sm:$0xff]  ;;  %v1933_v22 = vsel %vm616_vm5, %v1928_v1, %v1932_v30 }
 0x39f   : > { %2776 = vmatpush.bf16.msrb.mxu2 %v2721_v53  ;;  %2212 = vmatpush.bf16.msra.mxu0 %v2721_v53 }
 0x3a0   : > { %1936 = vrot.lane.b32.xlu0 %v1925_v11, %s2806_s7  ;;  %2237 = vmatpush.bf16.msra.mxu3 %v2732_v10  ;;  %v1907_v11 = vrot.slane %v3604_v62, 6 }
 0x3a2   : > { %v1908_v44 = vsel %vm602_vm13, %v1906_v19, %v1907_v11  ;;  %v1910_v12 = vsel %vm602_vm13, %v1907_v11, %v1909_v31 }
 0x3a3   : > { %1972 = vrot.lane.b32.xlu2 %v1963_v40, %s2807_s8  ;;  %2267 = vmatpush.bf16.msra.mxu2 %v2738_v27  ;;  %v1913_v27 = vrot.slane %v3694_v26, 6 }
 0x3a4   : > { %2238 = vmatpush.bf16.msra.mxu3 %v2731_v41 }
 0x3a6   : > { %1953 = vrot.lane.b32.xlu1 %v1948_v38, %s2808_s9 }
 0x3a7   : > { %2268 = vmatpush.bf16.msra.mxu2 %v2737_v63  ;;  %v1985_v63 = vrot.slane %v3694_v26, 4 }
 0x3a8   : > { %1938 = vrot.lane.b32.xlu0 %v1929_v25, %s2806_s7  ;;  %2239 = vmatpush.bf16.msra.mxu3 %v2730_v42 }
 0x3ab   : > { %1974 = vrot.lane.b32.xlu2 %v1967_v20, %s2807_s8 }
 0x3ac   : > { %2240 = vmatpush.bf16.msra.mxu3 %v2729_v2 }
 0x3ae   : > { %1865 = vrot.lane.b32.xlu1 %v1860_v17, %s2808_s9  ;;  %v1980_v17 = vrot.slane %v3604_v62, 4 }
 0x3b0   : > { %1850 = vrot.lane.b32.xlu0 %v1830_v51, %s2806_s7  ;;  %v1982_v51 = vsel %vm732_vm9, %v1980_v17, %v1981_v29 }
 0x3b3   : > { %1976 = vrot.lane.b32.xlu2 %v1971_v28, %s2807_s8 }
 0x3b6   : > { %1955 = vrot.lane.b32.xlu1 %v1947_v32, %s2808_s9 }
 0x3b8   : > { %1897 = vrot.lane.b32.xlu0 %v1879_v36, %s2807_s8 }
 0x3bb   : > { %1940 = vrot.lane.b32.xlu2 %v1933_v22, %s2806_s7 }
 0x3c3   : > { %1978 = vrot.lane.b32.xlu2 %v1970_v55, %s2807_s8 }
 0x3d5   : > { %v1900_v13 = vpop.permute.xlu2 %1899 }
 0x3e5   : > { %v1902_v18 = vpop.permute.xlu2 %1901 }
 0x3e8   : > { %v1868_v47 = vpop.permute.xlu1 %1867 }
 0x3ea   : > { %v1853_v43 = vpop.permute.xlu0 %1852 }
 0x3eb   : > { %v1990_v3 = vsel %vm746_vm8, %v3604_v62, %v1853_v43 }
 0x3ec   : > { %v1998_v49 = vsel %vm761_vm11, %v1990_v3, %v1868_v47  ;;  %v1986_v3 = vsel %vm732_vm9, %v1983_v58, %v1985_v63 }
 0x3ed   : > { %v2007_v37 = vsel %vm776_vm12, %v1998_v49, %v1900_v13 }
 0x3ee   : > { %2218 = vmatmul.bf16.vlgmr.msrb.gmra.mxu2 %v2007_v37 }
 0x3f5   : > { %v1904_v14 = vpop.permute.xlu2 %1903 }
 0x3f8   : > { %v1870_v57 = vpop.permute.xlu1 %1869 }
 0x3fa   : > { %v1855_v24 = vpop.permute.xlu0 %1854 }
 0x3fb   : > { %v1992_v50 = vsel %vm746_vm8, %v3614_v56, %v1855_v24 }
 0x3fc   : > { %v2000_v9 = vsel %vm761_vm11, %v1992_v50, %v1870_v57 }
 0x3fd   : > { %v2010_v34 = vsel %vm776_vm12, %v2000_v9, %v1902_v18  ;;  %v1973_v1 = vpop.permute.xlu2 %1972 }
 0x3fe   : > { %2223 = vmatmul.bf16.gmra.mxu2 %v2010_v34  ;;  %v2084_v34 = vperm.slane %v3589_v33, 3 }
 0x400   : > { %v1872_v21 = vpop.permute.xlu1 %1871 }
 0x402   : > { %v1857_v7 = vpop.permute.xlu0 %1856 }
 0x403   : > { %v1994_v60 = vsel %vm746_vm8, %v3654_v61, %v1857_v7  ;;  %v1914_v61 = vsel %vm602_vm13, %v1911_v45, %v1913_v27 }
 0x404   : > { %v2002_v40 = vsel %vm761_vm11, %v1994_v60, %v1872_v21 }
 0x405   : > { %v2013_v8 = vsel %vm776_vm12, %v2002_v40, %v1904_v14  ;;  %v1975_v48 = vpop.permute.xlu2 %1974 }
 0x408   : > { %v1950_v54 = vpop.permute.xlu1 %1949 }
 0x40a   : > { %v1935_v32 = vpop.permute.xlu0 %1934 }
 0x40b   : > { %v2017_v35 = vsel %vm746_vm8, %v1908_v44, %v1935_v32 }
 0x40c   : > { %v2028_v23 = vsel %vm761_vm11, %v2017_v35, %v1950_v54 }
 0x40d   : > { %v2036_v38 = vsel %vm776_vm12, %v2028_v23, %v1973_v1  ;;  %v1977_v62 = vpop.permute.xlu2 %1976 }
 0x40e   : > { %2228 = vmatmul.bf16.gmra.mxu2 %v2013_v8  ;;  %2241 = vmatmul.bf16.vlgmr.msra.gmra.mxu3 %v2036_v38 }
 0x410   : > { %v1952_v25 = vpop.permute.xlu1 %1951 }
 0x412   : > { %v1937_v5 = vpop.permute.xlu0 %1936 }
 0x413   : > { %v2020_v20 = vsel %vm746_vm8, %v1910_v12, %v1937_v5 }
 0x414   : > { %v2030_v4 = vsel %vm761_vm11, %v2020_v20, %v1952_v25 }
 0x415   : > { %v2039_v55 = vsel %vm776_vm12, %v2030_v4, %v1975_v48 }
 0x418   : > { %v1954_v59 = vpop.permute.xlu1 %1953 }
 0x41a   : > { %v1939_v0 = vpop.permute.xlu0 %1938 }
 0x41b   : > { %v2023_v56 = vsel %vm746_vm8, %v1912_v15, %v1939_v0 }
 0x41c   : > { %v2032_v36 = vsel %vm761_vm11, %v2023_v56, %v1954_v59 }
 0x41d   : > { %v2042_v22 = vsel %vm776_vm12, %v2032_v36, %v1977_v62 }
 0x41e   : > { %2246 = vmatmul.bf16.gmra.mxu3 %v2039_v55  ;;  %2676 = vmatmul.msk.bf16.vlgmr.msra.gmra.mxu2 %vm746_vm8, %v1982_v51 }
 0x420   : > { %v1866_v52 = vpop.permute.xlu1 %1865 }
 0x422   : > { %v1851_v28 = vpop.permute.xlu0 %1850 }
 0x423   : > { %v1988_v16 = vsel %vm746_vm8, %v3675_v46, %v1851_v28  ;;  %v1941_v46 = vpop.permute.xlu2 %1940 }
 0x424   : > { %v1996_v53 = vsel %vm761_vm11, %v1988_v16, %v1866_v52  ;;  %v2026_v41 = vsel %vm746_vm8, %v1914_v61, %v1941_v46 }
 0x428   : > { %v1956_v10 = vpop.permute.xlu1 %1955 }
 0x429   : > { %v2034_v42 = vsel %vm761_vm11, %v2026_v41, %v1956_v10 }
 0x42a   : > { %v1898_v30 = vpop.permute.xlu0 %1897 }
 0x42b   : > { %v2004_v6 = vsel %vm776_vm12, %v1996_v53, %v1898_v30  ;;  %v1979_v43 = vpop.permute.xlu2 %1978 }
 0x42c   : > { %2213 = vmatmul.bf16.vlgmr.msra.gmra.mxu0 %v2004_v6  ;;  %v2045_v47 = vsel %vm776_vm12, %v2034_v42, %v1979_v43 }
 0x42e   : > { %2251 = vmatmul.bf16.gmra.mxu3 %v2042_v22  ;;  %2677 = vmatmul.msk.bf16.gmra.mxu2 %vm746_vm8, %v1984_v39 }
 0x43e   : > { %2256 = vmatmul.bf16.gmra.mxu3 %v2045_v47  ;;  %2678 = vmatmul.msk.bf16.gmra.mxu2 %vm746_vm8, %v1986_v3 }
 0x44e   : > { %2679 = vmatmul.msk.bf16.gmra.mxu2 %vm746_vm8, %v1985_v63 }
 0x471   : > { %v2219_v13 = vpop.f32.mrf.mxu2 }
 0x472   : > { %v2220_v44 = vadd.f32 %v2219_v13, %v2084_v34 }
 0x479   : > { %v2221_v49 = vpop.f32.mrf.mxu2 }
 0x47a   : > { %v2222_v38 = vadd.f32 %v2221_v49, %v2084_v34 }
 0x481   : > { %v2224_v2 = vpop.f32.mrf.mxu2 }
 0x482   : > { %v2225_v20 = vadd.f32 %v2224_v2, %v2084_v34 }
 0x489   : > { %v2226_v37 = vpop.f32.mrf.mxu2 }
 0x48a   : > { %v2227_v48 = vadd.f32 %v2226_v37, %v2084_v34 }
 0x491   : > { %v2229_v57 = vpop.f32.mrf.mxu2  ;;  %v2242_v18 = vpop.f32.mrf.mxu3 }
 0x492   : > { %v2230_v28 = vadd.f32 %v2229_v57, %v2084_v34 }
 0x499   : > { %v2231_v26 = vpop.f32.mrf.mxu2  ;;  %v2244_v24 = vpop.f32.mrf.mxu3 }
 0x4a1   : > { %v2247_v50 = vpop.f32.mrf.mxu3  ;;  %v2270_v9 = vpop.f32.mrf.mxu2 }
 0x4a2   : > { %v2248_v33 = vadd.f32 %v2247_v50, %v2220_v44 }
 0x4a9   : > { %v2214_v21 = vpop.f32.mrf.mxu0  ;;  %v2249_v14 = vpop.f32.mrf.mxu3 }
 0x4aa   : > { %v2215_v7 = vadd.f32 %v2214_v21, %v2084_v34  ;;  %v2272_v11 = vpop.f32.mrf.mxu2  ;;  %v2250_v31 = vadd.f32 %v2249_v14, %v2222_v38 }
 0x4ac   : > { %v2243_v60 = vadd.f32 %v2242_v18, %v2215_v7 }
 0x4ae   : > { %v2271_v19 = vadd.f32 %v2270_v9, %v2243_v60 }
 0x4b0   : > { %2289 = vst.msk [vmem:[%s3856_s11] sm:$0xff] %vm746_vm8, %v2271_v19 }
 0x4b1   : > { %v2216_v32 = vpop.f32.mrf.mxu0  ;;  %v2252_v40 = vpop.f32.mrf.mxu3 }
 0x4b2   : > { %v2217_v54 = vadd.f32 %v2216_v32, %v2084_v34  ;;  %v2275_v35 = vpop.f32.mrf.mxu2  ;;  %v2253_v29 = vadd.f32 %v2252_v40, %v2225_v20 }
 0x4b3   : > { %v2276_v1 = vadd.f32 %v2275_v35, %v2248_v33 }
 0x4b4   : > { %v2245_v23 = vadd.f32 %v2244_v24, %v2217_v54 }
 0x4b5   : > { %2291 = vst.msk [vmem:[%s3856_s11 + $0x10] sm:$0xff] %vm746_vm8, %v2276_v1 }
 0x4b6   : > { %v2273_v8 = vadd.f32 %v2272_v11, %v2245_v23 }
 0x4b8   : > { %2290 = vst.msk [vmem:[%s3856_s11 + $0x8] sm:$0xff] %vm746_vm8, %v2273_v8 }
 0x4b9   : > { %v2254_v5 = vpop.f32.mrf.mxu3 }
 0x4ba   : > { %v2277_v25 = vpop.f32.mrf.mxu2  ;;  %v2255_v55 = vadd.f32 %v2254_v5, %v2227_v48 }
 0x4bb   : > { %v2278_v12 = vadd.f32 %v2277_v25, %v2250_v31 }
 0x4bd   : > { %2292 = vst.msk [vmem:[%s3856_s11 + $0x18] sm:$0xff] %vm746_vm8, %v2278_v12 }
 0x4c1   : > { %v2257_v0 = vpop.f32.mrf.mxu3 }
 0x4c2   : > { %v2280_v4 = vpop.f32.mrf.mxu2  ;;  %v2258_v15 = vadd.f32 %v2257_v0, %v2230_v28 }
 0x4c3   : > { %v2281_v17 = vadd.f32 %v2280_v4, %v2253_v29 }
 0x4c5   : > { %2293 = vst.msk [vmem:[%s3856_s11 + $0x20] sm:$0xff] %vm746_vm8, %v2281_v17 }
 0x4c9   : > { %v2259_v51 = vpop.f32.mrf.mxu3 }
 0x4ca   : > { %v2282_v59 = vpop.f32.mrf.mxu2 }
 0x4cb   : > { %v2283_v45 = vadd.f32 %v2282_v59, %v2255_v55 }
 0x4cd   : > { %2294 = vst.msk [vmem:[%s3856_s11 + $0x28] sm:$0xff] %vm746_vm8, %v2283_v45 }
 0x4d2   : > { %v2285_v56 = vpop.f32.mrf.mxu2 }
 0x4d3   : > { %v2286_v16 = vadd.f32 %v2285_v56, %v2258_v15 }
 0x4d5   : > { %2296 = vst.msk [vmem:[%s3856_s11 + $0x30] sm:$0x7f] %vm2295_vm0, %v2286_v16 }
 0x4da   : > { %v2287_v62 = vpop.f32.mrf.mxu2 }
 0x4db PF: > { %s14_s15 = sadd.s32 1, %s2803_s15  }
 0x4dc   : > { %p11_p4 = scmp.ge.s32.totalorder %s14_s15, 4  }
 0x4de   :  { %13 = sbr.rel (!%p11_p4) target bundleno = 1 (0x1), region = 68 }

</bundles_post_ra>
